<compile_context>
chip_gen: v5e
topology: v5e:2x2
jax: 0.10.0
libtpu: 0.0.40
codegen_flags: <defaults>
</compile_context>

<pallas_src>
import functools

import jax
import jax.numpy as jnp
from jax import lax
from jax.experimental import pallas as pl
from jax.experimental.pallas import tpu as pltpu

HIDDEN = 64             # PyTorch module's hidden width
LANE = 128              # TPU lane width; hidden / output dims padded to this
LARGE_BLOCK_BATCH = 512  # batch tile for big (replay-buffer) batches; multiple of 8 (f32) / 16 (bf16)
SINGLE_BLOCK_MAX = 1024  # below this, use a single grid step (block_batch == batch)


def dqn_kernel(x_ref, w1_ref, b1_ref, w2_ref, b2_ref, w3_ref, b3_ref,
               q_ref, act_ref, *, out_size, compute_dtype):
    # In-kernel activation cast (no separate wrapper-side astype launch).
    x = x_ref[...].astype(compute_dtype)

    # fc1 + ReLU  (f32 accumulate, f32 bias/ReLU)
    h1 = jnp.dot(x, w1_ref[...], preferred_element_type=jnp.float32) + b1_ref[...]
    h1 = jnp.maximum(h1, 0.0)

    # fc2 + ReLU
    h2 = jnp.dot(h1.astype(w2_ref.dtype), w2_ref[...],
                 preferred_element_type=jnp.float32) + b2_ref[...]
    h2 = jnp.maximum(h2, 0.0)

    # fc3 (no activation) — lane-dense (block_batch, 128) tile, unmasked store.
    q = jnp.dot(h2.astype(w3_ref.dtype), w3_ref[...],
                preferred_element_type=jnp.float32) + b3_ref[...]
    q_ref[...] = q.astype(q_ref.dtype)

    # Fused greedy action: argmax over the real (un-padded) Q columns.
    # Manual first-max-index (where/max/min) — padded columns masked to -inf.
    cols = lax.broadcasted_iota(jnp.int32, q.shape, 1)
    masked_q = jnp.where(cols < out_size, q, -jnp.inf)
    q_max = jnp.max(masked_q, axis=-1, keepdims=True)
    act = jnp.min(jnp.where(masked_q == q_max, cols, LANE), axis=-1, keepdims=True)
    act_ref[...] = act.astype(jnp.int32)


def init_dqn_params(key, input_size, output_size, hidden=HIDDEN):
    """Deterministic synthetic init (PyTorch-style uniform bounds); weights
    stored transposed as [in, out], biases as [1, out]."""
    ks = jax.random.split(key, 6)

    def linear(kw, kb, fan_in, fan_out):
        bound = 1.0 / jnp.sqrt(fan_in)
        w_t = jax.random.uniform(kw, (fan_in, fan_out), jnp.float32, -bound, bound)
        b = jax.random.uniform(kb, (1, fan_out), jnp.float32, -bound, bound)
        return w_t, b

    w1, b1 = linear(ks[0], ks[1], input_size, hidden)
    w2, b2 = linear(ks[2], ks[3], hidden, hidden)
    w3, b3 = linear(ks[4], ks[5], hidden, output_size)
    return {"w1": w1, "b1": b1, "w2": w2, "b2": b2, "w3": w3, "b3": b3}


def prepare_padded_params(params, compute_dtype=jnp.float32):
    """Zero-pad hidden/output dims to 128 lanes (do this ONCE, not per call).

    Matmul operands (weights) are cast to `compute_dtype` (bf16 on v6e/v7x for
    MXU throughput; keep f32 on v5e).  Biases stay f32 (bias add + ReLU run
    in f32)."""
    def pad_to(a, shape):
        return jnp.pad(a, [(0, s - d) for d, s in zip(a.shape, shape)])

    w1 = pad_to(params["w1"], (params["w1"].shape[0], LANE)).astype(compute_dtype)
    b1 = pad_to(params["b1"], (1, LANE)).astype(jnp.float32)
    w2 = pad_to(params["w2"], (LANE, LANE)).astype(compute_dtype)
    b2 = pad_to(params["b2"], (1, LANE)).astype(jnp.float32)
    w3 = pad_to(params["w3"], (LANE, LANE)).astype(compute_dtype)
    b3 = pad_to(params["b3"], (1, LANE)).astype(jnp.float32)
    return (w1, b1, w2, b2, w3, b3)


def _choose_block_batch(batch, requested):
    if requested is not None:
        return requested
    if batch <= SINGLE_BLOCK_MAX:
        # Single grid step: on 1-TC v5e/v6e extra steps are pure overhead.
        # On v7x, pass block_batch explicitly to get an even-length grid
        # (both TensorCores busy), e.g. block_batch = cdiv(batch, 2 * 8) * 8.
        return batch
    return LARGE_BLOCK_BATCH


def dqn_forward(x, padded_params, out_size, *, block_batch=None,
                compute_dtype=jnp.float32):
    """x: [batch, input_size] float32; padded_params from prepare_padded_params.

    Returns (q [batch, out_size] f32, actions [batch] int32 = argmax_a Q)."""
    w1, b1, w2, b2, w3, b3 = padded_params
    batch, in_size = x.shape
    bb = _choose_block_batch(batch, block_batch)
    grid = (pl.cdiv(batch, bb),)   # ragged last block handled by Pallas; no jnp.pad

    flops = 2 * batch * (in_size * LANE + LANE * LANE + LANE * LANE)
    bytes_accessed = int(
        x.size * x.dtype.itemsize
        + sum(int(a.size) * a.dtype.itemsize for a in (w1, b1, w2, b2, w3, b3))
        + batch * LANE * 4 + batch * 4)

    kernel = functools.partial(dqn_kernel, out_size=out_size,
                               compute_dtype=compute_dtype)

    q_padded, actions = pl.pallas_call(
        kernel,
        out_shape=(jax.ShapeDtypeStruct((batch, LANE), jnp.float32),
                   jax.ShapeDtypeStruct((batch, 1), jnp.int32)),
        grid=grid,
        in_specs=[
            # batch-tiled activations
            pl.BlockSpec((bb, in_size), lambda i: (i, 0)),
            # weights / biases: constant index_map -> VMEM-resident across steps.
            # (pipeline_mode single-buffering skipped: VMEM is nowhere near
            #  tight at these sizes, so it cannot move wall clock.)
            pl.BlockSpec(w1.shape, lambda i: (0, 0)),
            pl.BlockSpec(b1.shape, lambda i: (0, 0)),
            pl.BlockSpec(w2.shape, lambda i: (0, 0)),
            pl.BlockSpec(b2.shape, lambda i: (0, 0)),
            pl.BlockSpec(w3.shape, lambda i: (0, 0)),
            pl.BlockSpec(b3.shape, lambda i: (0, 0)),
        ],
        out_specs=(pl.BlockSpec((bb, LANE), lambda i: (i, 0)),
                   pl.BlockSpec((bb, 1), lambda i: (i, 0))),
        compiler_params=pltpu.CompilerParams(
            dimension_semantics=("parallel",)),  # batch tiles split across TCs (v7x)
        cost_estimate=pl.CostEstimate(
            flops=flops, transcendentals=0, bytes_accessed=bytes_accessed),
    )(x, w1, b1, w2, b2, w3, b3)

    # Q-values path keeps the module's forward semantics; actions are the
    # fused RL action-selection output (no extra launches needed downstream).
    return q_padded[:, :out_size], actions[:, 0]


def dqn_reference(x, params):
    """Pure-JAX reference of the PyTorch forward (unpadded)."""
    h1 = jnp.maximum(x @ params["w1"] + params["b1"], 0.0)
    h2 = jnp.maximum(h1 @ params["w2"] + params["b2"], 0.0)
    return h2 @ params["w3"] + params["b3"]


if __name__ == "__main__":
    key = jax.random.PRNGKey(0)
    k_params, k_x = jax.random.split(key)

    # Batched RL inference; 200 rows also exercises ragged-last-block handling
    # in the second call below.
    batch, input_size, output_size = 200, 16, 4
    params = init_dqn_params(k_params, input_size, output_size)
    padded_params = prepare_padded_params(params, compute_dtype=jnp.float32)
    x = jax.random.normal(k_x, (batch, input_size), jnp.float32)

    ref = dqn_reference(x, params)
    ref_actions = jnp.argmax(ref, axis=-1).astype(jnp.int32)

    # 1) Auto tiling: single grid step (small batch).
    q, actions = dqn_forward(x, padded_params, output_size)
    q = jax.block_until_ready(q)
    actions = jax.block_until_ready(actions)
    assert q.shape == (batch, output_size)
    assert actions.shape == (batch,)
    assert jnp.allclose(q, ref, atol=1e-4, rtol=1e-4), "Q mismatch vs reference"
    assert jnp.array_equal(actions, ref_actions), "action mismatch vs reference"

    # 2) Multi-step grid with a ragged last block (200 rows, 128-row tiles).
    q2, act2 = dqn_forward(x, padded_params, output_size, block_batch=128)
    q2 = jax.block_until_ready(q2)
    act2 = jax.block_until_ready(act2)
    assert jnp.allclose(q2, ref, atol=1e-4, rtol=1e-4), "Q mismatch (ragged grid)"
    assert jnp.array_equal(act2, ref_actions), "action mismatch (ragged grid)"

    print("KERNEL_OK")
</pallas_src>

<mosaic_0001>
module attributes {stable_mosaic.version = 11 : i64} {
  func.func @dqn_kernel(%arg0: i32, %arg1: memref<200x16xf32, #tpu.memory_space<vmem>>, %arg2: memref<16x128xf32, #tpu.memory_space<vmem>>, %arg3: memref<1x128xf32, #tpu.memory_space<vmem>>, %arg4: memref<128x128xf32, #tpu.memory_space<vmem>>, %arg5: memref<1x128xf32, #tpu.memory_space<vmem>>, %arg6: memref<128x128xf32, #tpu.memory_space<vmem>>, %arg7: memref<1x128xf32, #tpu.memory_space<vmem>>, %arg8: memref<200x128xf32, #tpu.memory_space<vmem>>, %arg9: memref<200x1xi32, #tpu.memory_space<vmem>>) attributes {dimension_semantics = [#tpu.dimension_semantics<parallel>], iteration_bounds = array<i64: 1>, scalar_prefetch = 0 : i64, scratch_operands = 0 : i64, tpu.core_type = #tpu.core_type<tc>, window_params = [{transform_indices = @transform_0, window_bounds = array<i64: 200, 16>}, {pipeline_mode = #tpu.pipeline_mode<synchronous>, transform_indices = @transform_1, window_bounds = array<i64: 16, 128>}, {pipeline_mode = #tpu.pipeline_mode<synchronous>, transform_indices = @transform_2, window_bounds = array<i64: 1, 128>}, {pipeline_mode = #tpu.pipeline_mode<synchronous>, transform_indices = @transform_3, window_bounds = array<i64: 128, 128>}, {pipeline_mode = #tpu.pipeline_mode<synchronous>, transform_indices = @transform_4, window_bounds = array<i64: 1, 128>}, {pipeline_mode = #tpu.pipeline_mode<synchronous>, transform_indices = @transform_5, window_bounds = array<i64: 128, 128>}, {pipeline_mode = #tpu.pipeline_mode<synchronous>, transform_indices = @transform_6, window_bounds = array<i64: 1, 128>}, {transform_indices = @transform_7, window_bounds = array<i64: 200, 128>}, {transform_indices = @transform_8, window_bounds = array<i64: 200, 1>}]} {
    %c0 = arith.constant 0 : index
    %c0_0 = arith.constant 0 : index
    %0 = vector.load %arg1[%c0, %c0_0] : memref<200x16xf32, #tpu.memory_space<vmem>>, vector<200x16xf32>
    %c0_1 = arith.constant 0 : index
    %c0_2 = arith.constant 0 : index
    %1 = vector.load %arg2[%c0_1, %c0_2] : memref<16x128xf32, #tpu.memory_space<vmem>>, vector<16x128xf32>
    %cst = arith.constant dense<0.000000e+00> : vector<200x128xf32>
    %2 = tpu.matmul %0, %1, %cst {dimension_numbers = #tpu.dot_dimension_numbers<[1], [0], [0], [1], [0, 0, 1, 1], [], []>} : vector<200x16xf32>, vector<16x128xf32>, vector<200x128xf32> -> vector<200x128xf32>
    %c0_3 = arith.constant 0 : index
    %c0_4 = arith.constant 0 : index
    %3 = vector.load %arg3[%c0_3, %c0_4] : memref<1x128xf32, #tpu.memory_space<vmem>>, vector<1x128xf32>
    %4 = vector.broadcast %3 : vector<1x128xf32> to vector<200x128xf32>
    %5 = arith.addf %2, %4 : vector<200x128xf32>
    %cst_5 = arith.constant 0.000000e+00 : f32
    %6 = vector.broadcast %cst_5 : f32 to vector<200x128xf32>
    %7 = arith.maximumf %5, %6 : vector<200x128xf32>
    %c0_6 = arith.constant 0 : index
    %c0_7 = arith.constant 0 : index
    %8 = vector.load %arg4[%c0_6, %c0_7] : memref<128x128xf32, #tpu.memory_space<vmem>>, vector<128x128xf32>
    %cst_8 = arith.constant dense<0.000000e+00> : vector<200x128xf32>
    %9 = tpu.matmul %7, %8, %cst_8 {dimension_numbers = #tpu.dot_dimension_numbers<[1], [0], [0], [1], [0, 0, 1, 1], [], []>} : vector<200x128xf32>, vector<128x128xf32>, vector<200x128xf32> -> vector<200x128xf32>
    %c0_9 = arith.constant 0 : index
    %c0_10 = arith.constant 0 : index
    %10 = vector.load %arg5[%c0_9, %c0_10] : memref<1x128xf32, #tpu.memory_space<vmem>>, vector<1x128xf32>
    %11 = vector.broadcast %10 : vector<1x128xf32> to vector<200x128xf32>
    %12 = arith.addf %9, %11 : vector<200x128xf32>
    %cst_11 = arith.constant 0.000000e+00 : f32
    %13 = vector.broadcast %cst_11 : f32 to vector<200x128xf32>
    %14 = arith.maximumf %12, %13 : vector<200x128xf32>
    %c0_12 = arith.constant 0 : index
    %c0_13 = arith.constant 0 : index
    %15 = vector.load %arg6[%c0_12, %c0_13] : memref<128x128xf32, #tpu.memory_space<vmem>>, vector<128x128xf32>
    %cst_14 = arith.constant dense<0.000000e+00> : vector<200x128xf32>
    %16 = tpu.matmul %14, %15, %cst_14 {dimension_numbers = #tpu.dot_dimension_numbers<[1], [0], [0], [1], [0, 0, 1, 1], [], []>} : vector<200x128xf32>, vector<128x128xf32>, vector<200x128xf32> -> vector<200x128xf32>
    %c0_15 = arith.constant 0 : index
    %c0_16 = arith.constant 0 : index
    %17 = vector.load %arg7[%c0_15, %c0_16] : memref<1x128xf32, #tpu.memory_space<vmem>>, vector<1x128xf32>
    %18 = vector.broadcast %17 : vector<1x128xf32> to vector<200x128xf32>
    %19 = arith.addf %16, %18 : vector<200x128xf32>
    %c0_17 = arith.constant 0 : index
    %c0_18 = arith.constant 0 : index
    %20 = vector.load %arg8[%c0_17, %c0_18] : memref<200x128xf32, #tpu.memory_space<vmem>>, vector<200x128xf32>
    tpu.vector_store %arg8[%c0_17, %c0_18], %19 {strides = array<i32>} : memref<200x128xf32, #tpu.memory_space<vmem>>, vector<200x128xf32>,
    %21 = tpu.iota {dimensions = array<i32: 1>} : vector<200x128xi32>
    %c4_i32 = arith.constant 4 : i32
    %22 = vector.broadcast %c4_i32 : i32 to vector<200x128xi32>
    %23 = arith.cmpi slt, %21, %22 : vector<200x128xi32>
    %cst_19 = arith.constant 0xFF800000 : f32
    %24 = vector.broadcast %cst_19 : f32 to vector<200x128xf32>
    %25 = arith.select %23, %19, %24 : vector<200x128xi1>, vector<200x128xf32>
    %cst_20 = arith.constant dense<0xFF800000> : vector<200xf32>
    %26 = vector.multi_reduction <maximumf>, %25, %cst_20 [1] : vector<200x128xf32> to vector<200xf32>
    %27 = vector.shape_cast %26 : vector<200xf32> to vector<200x1xf32>
    %28 = vector.broadcast %27 : vector<200x1xf32> to vector<200x128xf32>
    %29 = arith.cmpf oeq, %25, %28 : vector<200x128xf32>
    %c128_i32 = arith.constant 128 : i32
    %30 = vector.broadcast %c128_i32 : i32 to vector<200x128xi32>
    %31 = arith.select %29, %21, %30 : vector<200x128xi1>, vector<200x128xi32>
    %cst_21 = arith.constant dense<2147483647> : vector<200xi32>
    %32 = vector.multi_reduction <minsi>, %31, %cst_21 [1] : vector<200x128xi32> to vector<200xi32>
    %33 = vector.shape_cast %32 : vector<200xi32> to vector<200x1xi32>
    %c0_22 = arith.constant 0 : index
    %c0_23 = arith.constant 0 : index
    %34 = vector.load %arg9[%c0_22, %c0_23] : memref<200x1xi32, #tpu.memory_space<vmem>>, vector<200x1xi32>
    tpu.vector_store %arg9[%c0_22, %c0_23], %33 {strides = array<i32>} : memref<200x1xi32, #tpu.memory_space<vmem>>, vector<200x1xi32>,
    return
  }
  func.func @transform_0(%arg0: i32) -> (i32, i32) {
    %c0_i32 = arith.constant 0 : i32
    %c0_i32_0 = arith.constant 0 : i32
    return %arg0, %c0_i32 : i32, i32
  }
  func.func @transform_1(%arg0: i32) -> (i32, i32) {
    %c0_i32 = arith.constant 0 : i32
    %c0_i32_0 = arith.constant 0 : i32
    %c0_i32_1 = arith.constant 0 : i32
    return %c0_i32, %c0_i32_0 : i32, i32
  }
  func.func @transform_2(%arg0: i32) -> (i32, i32) {
    %c0_i32 = arith.constant 0 : i32
    %c0_i32_0 = arith.constant 0 : i32
    %c0_i32_1 = arith.constant 0 : i32
    return %c0_i32, %c0_i32_0 : i32, i32
  }
  func.func @transform_3(%arg0: i32) -> (i32, i32) {
    %c0_i32 = arith.constant 0 : i32
    %c0_i32_0 = arith.constant 0 : i32
    %c0_i32_1 = arith.constant 0 : i32
    return %c0_i32, %c0_i32_0 : i32, i32
  }
  func.func @transform_4(%arg0: i32) -> (i32, i32) {
    %c0_i32 = arith.constant 0 : i32
    %c0_i32_0 = arith.constant 0 : i32
    %c0_i32_1 = arith.constant 0 : i32
    return %c0_i32, %c0_i32_0 : i32, i32
  }
  func.func @transform_5(%arg0: i32) -> (i32, i32) {
    %c0_i32 = arith.constant 0 : i32
    %c0_i32_0 = arith.constant 0 : i32
    %c0_i32_1 = arith.constant 0 : i32
    return %c0_i32, %c0_i32_0 : i32, i32
  }
  func.func @transform_6(%arg0: i32) -> (i32, i32) {
    %c0_i32 = arith.constant 0 : i32
    %c0_i32_0 = arith.constant 0 : i32
    %c0_i32_1 = arith.constant 0 : i32
    return %c0_i32, %c0_i32_0 : i32, i32
  }
  func.func @transform_7(%arg0: i32) -> (i32, i32) {
    %c0_i32 = arith.constant 0 : i32
    %c0_i32_0 = arith.constant 0 : i32
    return %arg0, %c0_i32 : i32, i32
  }
  func.func @transform_8(%arg0: i32) -> (i32, i32) {
    %c0_i32 = arith.constant 0 : i32
    %c0_i32_0 = arith.constant 0 : i32
    return %arg0, %c0_i32 : i32, i32
  }
}

</mosaic_0001>

<bundles_post_ra>
// kernel: tpu_custom_call.1
= control target key start
LH: loop header
LB: loop body
LE: loop exit
PB: predicated region body
PF: predicated region fallthrough
CT: control target
= control target key end

     0   :  { %14 = vsyncpa [#allocation3], 0  ;;  %s2071_s0 = inlined_call_operand.vmem [shape: f32[200,16], index: 0, kind: input, shape index: {}]   ;;  %s2072_s1 = inlined_call_operand.vmem [shape: f32[16,128], index: 1, kind: input, shape index: {}]   ;;  %s2073_s2 = inlined_call_operand.vmem [shape: f32[1,128], index: 2, kind: input, shape index: {}]   ;;  %s2074_s3 = inlined_call_operand.vmem [shape: f32[128,128], index: 3, kind: input, shape index: {}]   ;;  %s2075_s4 = inlined_call_operand.vmem [shape: f32[1,128], index: 4, kind: input, shape index: {}]   ;;  %s2076_s5 = inlined_call_operand.hbm [shape: f32[128,128], index: 5, kind: input, shape index: {}]   ;;  %s2077_s6 = inlined_call_operand.vmem [shape: f32[1,128], index: 6, kind: input, shape index: {}]   ;;  %s2078_s7 = inlined_call_operand.hbm [shape: f32[200,128], index: 7, kind: output, shape index: {0}]   ;;  %s2079_s8 = inlined_call_operand.vmem [shape: s32[200,1], index: 8, kind: output, shape index: {1}]  }
   0x1   :  { %15 = vsyncpa [#allocation4], 0  ;;  %s30_s29 = sshll.u32 %s2076_s5, 4  ;;  %s1188_s30 = smov [#allocation2]   ;;  %s31_s29 = int_to_ptr.hbm [resolvable:$true] %s30_s29 }
   0x2   :  { %s32_s9 = sshll.u32 %s1188_s30, 4  ;;  %s1189_s10 = smov 128   ;;  %s33_s9 = int_to_ptr.vmem [resolvable:$true] %s32_s9 }
   0x3   :  { %s1190_s11 = smov 8  }
   0x4   :  { %38 = dma.hbm_to_vmem [thread:$0]  %s31_s29, 2048, %s33_s9, [#allocation3], %s1189_s10, %s1189_s10, %s1190_s11  }
   0x5   :  { %1184 = dma.done.wait [#allocation3], 2048  }
   0x6   :  { %1185 = vsyncadd [#allocation3], 4294965248  ;;  %v71_v0 = vld [vmem:[%s2072_s1 + $0x8] sm:$0xff]  ;;  %v70_v1 = vld [vmem:[%s2072_s1] sm:$0xff]  ;;  %vm76_vm0 = vcmask 130048   ;;  %s1191_s25 = smov [#allocation5]  }
   0x7   :  { %166 = vmatpush.msra.mxu0 %v71_v0  ;;  %v45_v2 = vld [vmem:[%s2071_s0] sm:$0xff]  ;;  %1095 = vmatpush.msra.mxu3 %v71_v0  ;;  %v46_v3 = vld [vmem:[%s2071_s0 + $0x8] sm:$0xff]  ;;  %v47_v4 = vld [vmem:[%s2071_s0 + $0x10] sm:$0xff]  ;;  %s1051_s26 = sshll.u32 %s1191_s25, 4  ;;  %s1053_s29 = sshll.u32 %s2078_s7, 4  ;;  %s1052_s26 = int_to_ptr.vmem [resolvable:$true] %s1051_s26  ;;  %s1054_s29 = int_to_ptr.hbm [resolvable:$true] %s1053_s29 }
   0x8   :  { %v48_v5 = vld [vmem:[%s2071_s0 + $0x18] sm:$0xff]  ;;  %v49_v6 = vld [vmem:[%s2071_s0 + $0x20] sm:$0xff]  ;;  %v50_v7 = vld [vmem:[%s2071_s0 + $0x28] sm:$0xff] }
   0x9   :  { %167 = vmatpush.msra.mxu0 %v70_v1  ;;  %1096 = vmatpush.msra.mxu3 %v70_v1  ;;  %v51_v8 = vld [vmem:[%s2071_s0 + $0x30] sm:$0xff]  ;;  %v52_v9 = vld [vmem:[%s2071_s0 + $0x38] sm:$0xff]  ;;  %v53_v10 = vld [vmem:[%s2071_s0 + $0x40] sm:$0xff] }
   0xa   :  { %1070 = vmatmul.msk.f32.vlgmr.msra.gmra.mxu0 %vm76_vm0, %v45_v2  ;;  %v284_v11 = vld [vmem:[%s2074_s3 + $0x78] sm:$0xff]  ;;  %v283_v12 = vld [vmem:[%s2074_s3 + $0x70] sm:$0xff]  ;;  %v282_v13 = vld [vmem:[%s2074_s3 + $0x68] sm:$0xff] }
   0xb   :  { %289 = vmatpush.msra.mxu1 %v284_v11  ;;  %1097 = vmatpush.msrb.mxu3 %v284_v11  ;;  %v54_v14 = vld [vmem:[%s2071_s0 + $0x48] sm:$0xff]  ;;  %v281_v15 = vld [vmem:[%s2074_s3 + $0x60] sm:$0xff]  ;;  %v280_v16 = vld [vmem:[%s2074_s3 + $0x58] sm:$0xff] }
   0xc   :  { %v279_v17 = vld [vmem:[%s2074_s3 + $0x50] sm:$0xff]  ;;  %v278_v18 = vld [vmem:[%s2074_s3 + $0x48] sm:$0xff]  ;;  %v277_v20 = vld [vmem:[%s2074_s3 + $0x40] sm:$0xff] }
   0xd   :  { %290 = vmatpush.msra.mxu1 %v283_v12  ;;  %1098 = vmatpush.msrb.mxu3 %v283_v12  ;;  %v55_v19 = vld [vmem:[%s2071_s0 + $0x50] sm:$0xff]  ;;  %v276_v21 = vld [vmem:[%s2074_s3 + $0x38] sm:$0xff]  ;;  %v274_v23 = vld [vmem:[%s2074_s3 + $0x28] sm:$0xff] }
   0xe   :  { %v275_v22 = vld [vmem:[%s2074_s3 + $0x30] sm:$0xff]  ;;  %v56_v24 = vld [vmem:[%s2071_s0 + $0x58] sm:$0xff]  ;;  %v273_v25 = vld [vmem:[%s2074_s3 + $0x20] sm:$0xff] }
   0xf   :  { %291 = vmatpush.msra.mxu1 %v282_v13  ;;  %1099 = vmatpush.msrb.mxu3 %v282_v13  ;;  %v272_v26 = vld [vmem:[%s2074_s3 + $0x18] sm:$0xff]  ;;  %v271_v27 = vld [vmem:[%s2074_s3 + $0x10] sm:$0xff]  ;;  %v57_v28 = vld [vmem:[%s2071_s0 + $0x60] sm:$0xff] }
  0x10   :  { %v270_v29 = vld [vmem:[%s2074_s3 + $0x8] sm:$0xff]  ;;  %v269_v30 = vld [vmem:[%s2074_s3] sm:$0xff]  ;;  %v59_v32 = vld [vmem:[%s2071_s0 + $0x70] sm:$0xff] }
  0x11   :  { %292 = vmatpush.msra.mxu1 %v281_v15  ;;  %1100 = vmatpush.msrb.mxu3 %v281_v15  ;;  %v58_v31 = vld [vmem:[%s2071_s0 + $0x68] sm:$0xff]  ;;  %v60_v33 = vld [vmem:[%s2071_s0 + $0x78] sm:$0xff]  ;;  %v1364_v34 = vld [vmem:[%s2073_s2] ss:$0 sm:$0xff] }
  0x12   :  { %1071 = vmatmul.msk.f32.gmra.mxu0 %vm76_vm0, %v46_v3  ;;  %v61_v36 = vld [vmem:[%s2071_s0 + $0x80] sm:$0xff]  ;;  %v66_v39 = vld [vmem:[%s2071_s0 + $0xa8] sm:$0xff]  ;;  %v67_v44 = vld [vmem:[%s2071_s0 + $0xb0] sm:$0xff] }
  0x13   :  { %293 = vmatpush.msra.mxu1 %v280_v16  ;;  %1101 = vmatpush.msrb.mxu3 %v280_v16  ;;  %v62_v41 = vld [vmem:[%s2071_s0 + $0x88] sm:$0xff]  ;;  %v63_v46 = vld [vmem:[%s2071_s0 + $0x90] sm:$0xff]  ;;  %v68_v49 = vld [vmem:[%s2071_s0 + $0xb8] sm:$0xff] }
  0x14   :  { %1091 = vmatmul.msk.f32.vlgmr.msra.gmra.mxu3 %vm76_vm0, %v66_v39  ;;  %v64_v51 = vld [vmem:[%s2071_s0 + $0x98] sm:$0xff]  ;;  %v69_v54 = vld [vmem:[%s2071_s0 + $0xc0] sm:$0xff]  ;;  %v419_v12 = vld [vmem:[#allocation2 + $0x68] sm:$0xff] }
  0x15   :  { %294 = vmatpush.msra.mxu1 %v279_v17  ;;  %1102 = vmatpush.msrb.mxu3 %v279_v17  ;;  %v65_v56 = vld [vmem:[%s2071_s0 + $0xa0] sm:$0xff]  ;;  %v416_v17 = vld [vmem:[#allocation2 + $0x50] sm:$0xff] }
  0x16   :  { %v418_v13 = vld [vmem:[#allocation2 + $0x60] sm:$0xff] }
  0x17   :  { %295 = vmatpush.msra.mxu1 %v278_v18  ;;  %1103 = vmatpush.msrb.mxu3 %v278_v18 }
  0x19   :  { %296 = vmatpush.msra.mxu1 %v277_v20  ;;  %1104 = vmatpush.msrb.mxu3 %v277_v20  ;;  %v414_v20 = vld [vmem:[#allocation2 + $0x40] sm:$0xff] }
  0x1a   :  { %1072 = vmatmul.msk.f32.gmra.mxu0 %vm76_vm0, %v47_v4 }
  0x1b   :  { %297 = vmatpush.msra.mxu1 %v276_v21  ;;  %1105 = vmatpush.msrb.mxu3 %v276_v21  ;;  %v413_v21 = vld [vmem:[#allocation2 + $0x38] sm:$0xff] }
  0x1c   :  { %1092 = vmatmul.msk.f32.gmra.mxu3 %vm76_vm0, %v67_v44 }
  0x1d   :  { %298 = vmatpush.msra.mxu1 %v275_v22  ;;  %1106 = vmatpush.msrb.mxu3 %v275_v22 }
  0x1f   :  { %299 = vmatpush.msra.mxu1 %v274_v23  ;;  %1107 = vmatpush.msrb.mxu3 %v274_v23 }
  0x21   :  { %300 = vmatpush.msra.mxu1 %v273_v25  ;;  %1108 = vmatpush.msrb.mxu3 %v273_v25 }
  0x22   :  { %1073 = vmatmul.msk.f32.gmra.mxu0 %vm76_vm0, %v48_v5 }
  0x23   :  { %301 = vmatpush.msra.mxu1 %v272_v26  ;;  %1109 = vmatpush.msrb.mxu3 %v272_v26  ;;  %v411_v26 = vld [vmem:[#allocation2 + $0x28] sm:$0xff] }
  0x24   :  { %1093 = vmatmul.msk.f32.gmra.mxu3 %vm76_vm0, %v68_v49 }
  0x25   :  { %302 = vmatpush.msra.mxu1 %v271_v27  ;;  %1110 = vmatpush.msrb.mxu3 %v271_v27  ;;  %v410_v27 = vld [vmem:[#allocation2 + $0x20] sm:$0xff] }
  0x27   :  { %303 = vmatpush.msra.mxu1 %v270_v29  ;;  %1111 = vmatpush.msrb.mxu3 %v270_v29 }
  0x29   :  { %304 = vmatpush.msra.mxu1 %v269_v30  ;;  %1112 = vmatpush.msrb.mxu3 %v269_v30 }
  0x2a   :  { %1074 = vmatmul.msk.f32.gmra.mxu0 %vm76_vm0, %v49_v6 }
  0x2c   :  { %1094 = vmatmul.msk.f32.gmra.mxu3 %vm76_vm0, %v69_v54 }
  0x32   :  { %1075 = vmatmul.msk.f32.gmra.mxu0 %vm76_vm0, %v50_v7  ;;  %v421_v7 = vld [vmem:[#allocation2 + $0x78] sm:$0xff] }
  0x33   :  { %426 = vmatpush.msra.mxu2 %v421_v7  ;;  %1113 = vmatpush.msra.mxu3 %v421_v7 }
  0x3a   :  { %1076 = vmatmul.msk.f32.gmra.mxu0 %vm76_vm0, %v51_v8 }
  0x42   :  { %1077 = vmatmul.msk.f32.gmra.mxu0 %vm76_vm0, %v52_v9 }
  0x4a   :  { %1078 = vmatmul.msk.f32.gmra.mxu0 %vm76_vm0, %v53_v10  ;;  %v420_v10 = vld [vmem:[#allocation2 + $0x70] sm:$0xff] }
  0x4b   :  { %427 = vmatpush.msra.mxu2 %v420_v10  ;;  %1114 = vmatpush.msra.mxu3 %v420_v10 }
  0x4d   :  { %428 = vmatpush.msra.mxu2 %v419_v12  ;;  %1115 = vmatpush.msra.mxu3 %v419_v12 }
  0x4f   :  { %429 = vmatpush.msra.mxu2 %v418_v13  ;;  %1116 = vmatpush.msra.mxu3 %v418_v13 }
  0x52   :  { %1079 = vmatmul.msk.f32.gmra.mxu0 %vm76_vm0, %v54_v14  ;;  %v417_v14 = vld [vmem:[#allocation2 + $0x58] sm:$0xff] }
  0x53   :  { %430 = vmatpush.msra.mxu2 %v417_v14  ;;  %1117 = vmatpush.msra.mxu3 %v417_v14 }
  0x55   :  { %431 = vmatpush.msra.mxu2 %v416_v17  ;;  %1118 = vmatpush.msra.mxu3 %v416_v17 }
  0x5a   :  { %1080 = vmatmul.msk.f32.gmra.mxu0 %vm76_vm0, %v55_v19  ;;  %v415_v19 = vld [vmem:[#allocation2 + $0x48] sm:$0xff] }
  0x5b   :  { %432 = vmatpush.msra.mxu2 %v415_v19  ;;  %1119 = vmatpush.msra.mxu3 %v415_v19 }
  0x5d   :  { %433 = vmatpush.msra.mxu2 %v414_v20  ;;  %1120 = vmatpush.msra.mxu3 %v414_v20 }
  0x5f   :  { %434 = vmatpush.msra.mxu2 %v413_v21  ;;  %1121 = vmatpush.msra.mxu3 %v413_v21 }
  0x62   :  { %1081 = vmatmul.msk.f32.gmra.mxu0 %vm76_vm0, %v56_v24  ;;  %v412_v24 = vld [vmem:[#allocation2 + $0x30] sm:$0xff] }
  0x63   :  { %435 = vmatpush.msra.mxu2 %v412_v24  ;;  %1122 = vmatpush.msra.mxu3 %v412_v24 }
  0x65   :  { %436 = vmatpush.msra.mxu2 %v411_v26  ;;  %1123 = vmatpush.msra.mxu3 %v411_v26 }
  0x67   :  { %437 = vmatpush.msra.mxu2 %v410_v27  ;;  %1124 = vmatpush.msra.mxu3 %v410_v27 }
  0x6a   :  { %1082 = vmatmul.msk.f32.gmra.mxu0 %vm76_vm0, %v57_v28  ;;  %v409_v28 = vld [vmem:[#allocation2 + $0x18] sm:$0xff] }
  0x6b   :  { %438 = vmatpush.msra.mxu2 %v409_v28  ;;  %1125 = vmatpush.msra.mxu3 %v409_v28 }
  0x72   :  { %1083 = vmatmul.msk.f32.gmra.mxu0 %vm76_vm0, %v58_v31  ;;  %v408_v31 = vld [vmem:[#allocation2 + $0x10] sm:$0xff] }
  0x73   :  { %439 = vmatpush.msra.mxu2 %v408_v31  ;;  %1126 = vmatpush.msra.mxu3 %v408_v31 }
  0x7a   :  { %1084 = vmatmul.msk.f32.gmra.mxu0 %vm76_vm0, %v59_v32 }
  0x82   :  { %1085 = vmatmul.msk.f32.gmra.mxu0 %vm76_vm0, %v60_v33  ;;  %v407_v33 = vld [vmem:[#allocation2 + $0x8] sm:$0xff] }
  0x83   :  { %440 = vmatpush.msra.mxu2 %v407_v33  ;;  %1127 = vmatpush.msra.mxu3 %v407_v33 }
  0x87   :  { %v169_v35 = vpop.f32.mrf.mxu0 }
  0x88   :  { %v170_v37 = vadd.f32 %v1364_v34, %v169_v35  ;;  %v406_v35 = vld [vmem:[#allocation2] sm:$0xff] }
  0x89   :  { %441 = vmatpush.msra.mxu2 %v406_v35  ;;  %1128 = vmatpush.msra.mxu3 %v406_v35 }
  0x8a   :  { %v244_v38 = vmax.f32 %v170_v37, 0.0  ;;  %1086 = vmatmul.msk.f32.gmra.mxu0 %vm76_vm0, %v61_v36 }
  0x8c   :  { %305 = vmatmul.f32.vlgmr.msra.gmra.mxu1 %v244_v38 }
  0x8f   :  { %v172_v40 = vpop.f32.mrf.mxu0 }
  0x90   :  { %v173_v42 = vadd.f32 %v1364_v34, %v172_v40 }
  0x92   :  { %v245_v43 = vmax.f32 %v173_v42, 0.0  ;;  %1087 = vmatmul.msk.f32.gmra.mxu0 %vm76_vm0, %v62_v41 }
  0x94   :  { %308 = vmatmul.f32.gmra.mxu1 %v245_v43 }
  0x97   :  { %v175_v45 = vpop.f32.mrf.mxu0 }
  0x98   :  { %v176_v47 = vadd.f32 %v1364_v34, %v175_v45  ;;  %v1421_v45 = vld [vmem:[%s2075_s4] ss:$0 sm:$0xff] }
  0x9a   :  { %v246_v48 = vmax.f32 %v176_v47, 0.0  ;;  %1088 = vmatmul.msk.f32.gmra.mxu0 %vm76_vm0, %v63_v46 }
  0x9c   :  { %311 = vmatmul.f32.gmra.mxu1 %v246_v48 }
  0x9f   :  { %v178_v50 = vpop.f32.mrf.mxu0 }
  0xa0   :  { %v179_v52 = vadd.f32 %v1364_v34, %v178_v50 }
  0xa2   :  { %v247_v53 = vmax.f32 %v179_v52, 0.0  ;;  %1089 = vmatmul.msk.f32.gmra.mxu0 %vm76_vm0, %v64_v51 }
  0xa4   :  { %314 = vmatmul.f32.gmra.mxu1 %v247_v53 }
  0xa7   :  { %v181_v55 = vpop.f32.mrf.mxu0 }
  0xa8   :  { %v182_v57 = vadd.f32 %v1364_v34, %v181_v55 }
  0xaa   :  { %v248_v58 = vmax.f32 %v182_v57, 0.0  ;;  %1090 = vmatmul.msk.f32.gmra.mxu0 %vm76_vm0, %v65_v56 }
  0xac   :  { %317 = vmatmul.f32.gmra.mxu1 %v248_v58 }
  0xaf   :  { %v184_v59 = vpop.f32.mrf.mxu0 }
  0xb0   :  { %v185_v60 = vadd.f32 %v1364_v34, %v184_v59 }
  0xb2   :  { %v249_v61 = vmax.f32 %v185_v60, 0.0 }
  0xb4   :  { %320 = vmatmul.f32.gmra.mxu1 %v249_v61 }
  0xb7   :  { %v187_v62 = vpop.f32.mrf.mxu0 }
  0xb8   :  { %v188_v63 = vadd.f32 %v1364_v34, %v187_v62 }
  0xba   :  { %v250_v0 = vmax.f32 %v188_v63, 0.0 }
  0xbc   :  { %323 = vmatmul.f32.gmra.mxu1 %v250_v0 }
  0xbf   :  { %v190_v1 = vpop.f32.mrf.mxu0 }
  0xc0   :  { %v191_v2 = vadd.f32 %v1364_v34, %v190_v1 }
  0xc2   :  { %v251_v3 = vmax.f32 %v191_v2, 0.0 }
  0xc4   :  { %326 = vmatmul.f32.gmra.mxu1 %v251_v3 }
  0xc7   :  { %v193_v4 = vpop.f32.mrf.mxu0 }
  0xc8   :  { %v194_v5 = vadd.f32 %v1364_v34, %v193_v4 }
  0xca   :  { %v252_v6 = vmax.f32 %v194_v5, 0.0  ;;  %v232_v5 = vpop.f32.mrf.mxu3 }
  0xcb   :  { %v233_v13 = vadd.f32 %v1364_v34, %v232_v5 }
  0xcc   :  { %329 = vmatmul.f32.gmra.mxu1 %v252_v6 }
  0xcf   :  { %v196_v8 = vpop.f32.mrf.mxu0 }
  0xd0   :  { %v197_v9 = vadd.f32 %v1364_v34, %v196_v8 }
  0xd2   :  { %v253_v11 = vmax.f32 %v197_v9, 0.0  ;;  %v235_v14 = vpop.f32.mrf.mxu3 }
  0xd3   :  { %v236_v19 = vadd.f32 %v1364_v34, %v235_v14 }
  0xd4   :  { %332 = vmatmul.f32.gmra.mxu1 %v253_v11 }
  0xd5   :  { %v266_v21 = vmax.f32 %v236_v19, 0.0 }
  0xd7   :  { %v199_v15 = vpop.f32.mrf.mxu0 }
  0xd8   :  { %v200_v16 = vadd.f32 %v1364_v34, %v199_v15  ;;  %v265_v15 = vmax.f32 %v233_v13, 0.0 }
  0xda   :  { %v254_v18 = vmax.f32 %v200_v16, 0.0  ;;  %v238_v20 = vpop.f32.mrf.mxu3 }
  0xdc   :  { %335 = vmatmul.f32.gmra.mxu1 %v254_v18 }
  0xdf   :  { %v202_v22 = vpop.f32.mrf.mxu0 }
  0xe0   :  { %v203_v23 = vadd.f32 %v1364_v34, %v202_v22 }
  0xe2   :  { %v255_v25 = vmax.f32 %v203_v23, 0.0  ;;  %v241_v28 = vpop.f32.mrf.mxu3 }
  0xe3   :  { %v242_v31 = vadd.f32 %v1364_v34, %v241_v28 }
  0xe4   :  { %338 = vmatmul.f32.gmra.mxu1 %v255_v25  ;;  %v239_v25 = vadd.f32 %v1364_v34, %v238_v20 }
  0xe6   :  { %v267_v26 = vmax.f32 %v239_v25, 0.0 }
  0xe7   :  { %v205_v29 = vpop.f32.mrf.mxu0 }
  0xe8   :  { %v206_v30 = vadd.f32 %v1364_v34, %v205_v29 }
  0xea   :  { %v256_v32 = vmax.f32 %v206_v30, 0.0 }
  0xec   :  { %341 = vmatmul.f32.gmra.mxu1 %v256_v32  ;;  %v268_v32 = vmax.f32 %v242_v31, 0.0 }
  0xef   :  { %v208_v36 = vpop.f32.mrf.mxu0 }
  0xf0   :  { %v209_v37 = vadd.f32 %v1364_v34, %v208_v36 }
  0xf2   :  { %v257_v38 = vmax.f32 %v209_v37, 0.0 }
  0xf4   :  { %344 = vmatmul.f32.gmra.mxu1 %v257_v38 }
  0xf7   :  { %v211_v39 = vpop.f32.mrf.mxu0 }
  0xf8   :  { %v212_v40 = vadd.f32 %v1364_v34, %v211_v39 }
  0xfa   :  { %v258_v41 = vmax.f32 %v212_v40, 0.0 }
  0xfc   :  { %347 = vmatmul.f32.gmra.mxu1 %v258_v41 }
  0xff   :  { %v214_v42 = vpop.f32.mrf.mxu0 }
 0x100   :  { %v215_v43 = vadd.f32 %v1364_v34, %v214_v42 }
 0x102   :  { %v259_v44 = vmax.f32 %v215_v43, 0.0 }
 0x104   :  { %350 = vmatmul.f32.gmra.mxu1 %v259_v44 }
 0x107   :  { %v217_v46 = vpop.f32.mrf.mxu0 }
 0x108   :  { %v218_v47 = vadd.f32 %v1364_v34, %v217_v46 }
 0x109   :  { %v306_v48 = vpop.f32.mrf.mxu1 }
 0x10a   :  { %v260_v49 = vmax.f32 %v218_v47, 0.0  ;;  %v307_v50 = vadd.f32 %v1421_v45, %v306_v48 }
 0x10c   :  { %v381_v51 = vmax.f32 %v307_v50, 0.0  ;;  %353 = vmatmul.f32.gmra.mxu1 %v260_v49 }
 0x10e   :  { %442 = vmatmul.f32.vlgmr.msra.gmra.mxu2 %v381_v51 }
 0x10f   :  { %v220_v52 = vpop.f32.mrf.mxu0 }
 0x110   :  { %v221_v53 = vadd.f32 %v1364_v34, %v220_v52 }
 0x111   :  { %v309_v54 = vpop.f32.mrf.mxu1 }
 0x112   :  { %v261_v55 = vmax.f32 %v221_v53, 0.0  ;;  %v310_v56 = vadd.f32 %v1421_v45, %v309_v54 }
 0x114   :  { %v382_v57 = vmax.f32 %v310_v56, 0.0  ;;  %356 = vmatmul.f32.gmra.mxu1 %v261_v55 }
 0x116   :  { %445 = vmatmul.f32.gmra.mxu2 %v382_v57 }
 0x117   :  { %v223_v58 = vpop.f32.mrf.mxu0 }
 0x118   :  { %v224_v59 = vadd.f32 %v1364_v34, %v223_v58 }
 0x119   :  { %v312_v60 = vpop.f32.mrf.mxu1 }
 0x11a   :  { %v262_v61 = vmax.f32 %v224_v59, 0.0  ;;  %v313_v62 = vadd.f32 %v1421_v45, %v312_v60  ;;  %v543_v59 = vlaneseq }
 0x11c   :  { %v383_v63 = vmax.f32 %v313_v62, 0.0  ;;  %359 = vmatmul.f32.vlgmr.msrb.gmra.mxu3 %v262_v61  ;;  %v1449_v62 = vand.u32 127, %v543_v59 }
 0x11e   :  { %448 = vmatmul.f32.gmra.mxu2 %v383_v63  ;;  %v1454_v63 = vld [vmem:[%s2077_s6] ss:$0 sm:$0xff]  ;;  %vm545_vm1 = vcmp.lt.s32.totalorder %v1449_v62, 4 }
 0x11f   :  { %v226_v0 = vpop.f32.mrf.mxu0 }
 0x120   :  { %v227_v1 = vadd.f32 %v1364_v34, %v226_v0 }
 0x121   :  { %v315_v2 = vpop.f32.mrf.mxu1 }
 0x122   :  { %v263_v3 = vmax.f32 %v227_v1, 0.0  ;;  %v316_v4 = vadd.f32 %v1421_v45, %v315_v2 }
 0x124   :  { %v384_v6 = vmax.f32 %v316_v4, 0.0  ;;  %362 = vmatmul.f32.gmra.mxu3 %v263_v3 }
 0x126   :  { %451 = vmatmul.f32.gmra.mxu2 %v384_v6 }
 0x127   :  { %v229_v7 = vpop.f32.mrf.mxu0 }
 0x128   :  { %v230_v8 = vadd.f32 %v1364_v34, %v229_v7 }
 0x129   :  { %v318_v9 = vpop.f32.mrf.mxu1 }
 0x12a   :  { %v264_v10 = vmax.f32 %v230_v8, 0.0  ;;  %v319_v11 = vadd.f32 %v1421_v45, %v318_v9 }
 0x12c   :  { %v385_v12 = vmax.f32 %v319_v11, 0.0  ;;  %365 = vmatmul.f32.gmra.mxu3 %v264_v10 }
 0x12e   :  { %454 = vmatmul.f32.gmra.mxu2 %v385_v12 }
 0x131   :  { %v321_v16 = vpop.f32.mrf.mxu1 }
 0x132   :  { %v322_v17 = vadd.f32 %v1421_v45, %v321_v16 }
 0x134   :  { %v386_v18 = vmax.f32 %v322_v17, 0.0  ;;  %368 = vmatmul.f32.gmra.mxu3 %v265_v15 }
 0x136   :  { %457 = vmatmul.f32.gmra.mxu2 %v386_v18 }
 0x139   :  { %v324_v22 = vpop.f32.mrf.mxu1 }
 0x13a   :  { %v325_v23 = vadd.f32 %v1421_v45, %v324_v22 }
 0x13c   :  { %v387_v24 = vmax.f32 %v325_v23, 0.0  ;;  %371 = vmatmul.f32.gmra.mxu3 %v266_v21 }
 0x13e   :  { %460 = vmatmul.f32.gmra.mxu2 %v387_v24 }
 0x141   :  { %v327_v27 = vpop.f32.mrf.mxu1 }
 0x142   :  { %v328_v29 = vadd.f32 %v1421_v45, %v327_v27 }
 0x144   :  { %v388_v30 = vmax.f32 %v328_v29, 0.0  ;;  %374 = vmatmul.f32.gmra.mxu3 %v267_v26 }
 0x146   :  { %463 = vmatmul.f32.gmra.mxu2 %v388_v30 }
 0x149   :  { %v330_v33 = vpop.f32.mrf.mxu1 }
 0x14a   :  { %v331_v35 = vadd.f32 %v1421_v45, %v330_v33 }
 0x14c   :  { %v389_v36 = vmax.f32 %v331_v35, 0.0  ;;  %377 = vmatmul.f32.gmra.mxu3 %v268_v32 }
 0x14e   :  { %466 = vmatmul.f32.gmra.mxu2 %v389_v36 }
 0x151   :  { %v333_v37 = vpop.f32.mrf.mxu1 }
 0x152   :  { %v334_v38 = vadd.f32 %v1421_v45, %v333_v37 }
 0x154   :  { %v390_v39 = vmax.f32 %v334_v38, 0.0 }
 0x156   :  { %469 = vmatmul.f32.gmra.mxu2 %v390_v39 }
 0x159   :  { %v336_v40 = vpop.f32.mrf.mxu1 }
 0x15a   :  { %v337_v41 = vadd.f32 %v1421_v45, %v336_v40 }
 0x15c   :  { %v391_v42 = vmax.f32 %v337_v41, 0.0 }
 0x15e   :  { %472 = vmatmul.f32.gmra.mxu2 %v391_v42 }
 0x161   :  { %v339_v43 = vpop.f32.mrf.mxu1 }
 0x162   :  { %v340_v34 = vadd.f32 %v1421_v45, %v339_v43 }
 0x164   :  { %v392_v44 = vmax.f32 %v340_v34, 0.0 }
 0x166   :  { %475 = vmatmul.f32.gmra.mxu2 %v392_v44 }
 0x169   :  { %v342_v46 = vpop.f32.mrf.mxu1 }
 0x16a   :  { %v343_v47 = vadd.f32 %v1421_v45, %v342_v46 }
 0x16c   :  { %v393_v48 = vmax.f32 %v343_v47, 0.0 }
 0x16e   :  { %478 = vmatmul.f32.gmra.mxu2 %v393_v48 }
 0x171   :  { %v345_v49 = vpop.f32.mrf.mxu1 }
 0x172   :  { %v346_v50 = vadd.f32 %v1421_v45, %v345_v49 }
 0x174   :  { %v394_v51 = vmax.f32 %v346_v50, 0.0 }
 0x176   :  { %481 = vmatmul.f32.gmra.mxu2 %v394_v51 }
 0x179   :  { %v348_v52 = vpop.f32.mrf.mxu1 }
 0x17a   :  { %v349_v53 = vadd.f32 %v1421_v45, %v348_v52 }
 0x17c   :  { %v395_v54 = vmax.f32 %v349_v53, 0.0 }
 0x17e   :  { %484 = vmatmul.f32.gmra.mxu2 %v395_v54 }
 0x181   :  { %v351_v55 = vpop.f32.mrf.mxu1 }
 0x182   :  { %v352_v56 = vadd.f32 %v1421_v45, %v351_v55 }
 0x184   :  { %v396_v57 = vmax.f32 %v352_v56, 0.0 }
 0x186   :  { %487 = vmatmul.f32.gmra.mxu2 %v396_v57 }
 0x189   :  { %v354_v58 = vpop.f32.mrf.mxu1 }
 0x18a   :  { %v355_v60 = vadd.f32 %v1421_v45, %v354_v58 }
 0x18c   :  { %v397_v61 = vmax.f32 %v355_v60, 0.0 }
 0x18e   :  { %490 = vmatmul.f32.gmra.mxu2 %v397_v61 }
 0x191   :  { %v357_v0 = vpop.f32.mrf.mxu1  ;;  %v443_v1 = vpop.f32.mrf.mxu2 }
 0x192   :  { %v358_v2 = vadd.f32 %v1421_v45, %v357_v0  ;;  %v444_v3 = vadd.f32 %v1454_v63, %v443_v1 }
 0x194   :  { %v398_v4 = vmax.f32 %v358_v2, 0.0  ;;  %518 = vst [vmem:[#allocation5] sm:$0xff] %v444_v3  ;;  %v1461_v5 = vsel %vm545_vm1, %v444_v3, -inf }
 0x195   :  { %571 = vmax.xlane.f32.xlu0 %v1461_v5 }
 0x196   :  { %493 = vmatmul.f32.gmra.mxu2 %v398_v4 }
 0x199   :  { %v446_v6 = vpop.f32.mrf.mxu2 }
 0x19a   :  { %v447_v7 = vadd.f32 %v1454_v63, %v446_v6 }
 0x19c   :  { %519 = vst [vmem:[#allocation5 + $0x8] sm:$0xff] %v447_v7  ;;  %v1467_v8 = vsel %vm545_vm1, %v447_v7, -inf }
 0x19d   :  { %573 = vmax.xlane.f32.xlu0 %v1467_v8 }
 0x19f   :  { %v360_v9 = vpop.f32.mrf.mxu3 }
 0x1a0   :  { %v361_v10 = vadd.f32 %v1421_v45, %v360_v9 }
 0x1a1   :  { %v449_v11 = vpop.f32.mrf.mxu2 }
 0x1a2   :  { %v399_v12 = vmax.f32 %v361_v10, 0.0  ;;  %v450_v13 = vadd.f32 %v1454_v63, %v449_v11 }
 0x1a4   :  { %520 = vst [vmem:[#allocation5 + $0x10] sm:$0xff] %v450_v13  ;;  %496 = vmatmul.f32.vlgmr.msra.gmra.mxu3 %v399_v12  ;;  %v1474_v14 = vsel %vm545_vm1, %v450_v13, -inf }
 0x1a5   :  { %575 = vmax.xlane.f32.xlu1 %v1474_v14 }
 0x1a7   :  { %v363_v15 = vpop.f32.mrf.mxu3 }
 0x1a8   :  { %v364_v16 = vadd.f32 %v1421_v45, %v363_v15 }
 0x1a9   :  { %v452_v17 = vpop.f32.mrf.mxu2 }
 0x1aa   :  { %v400_v18 = vmax.f32 %v364_v16, 0.0  ;;  %v453_v19 = vadd.f32 %v1454_v63, %v452_v17 }
 0x1ac   :  { %521 = vst [vmem:[#allocation5 + $0x18] sm:$0xff] %v453_v19  ;;  %499 = vmatmul.f32.gmra.mxu3 %v400_v18  ;;  %v1481_v20 = vsel %vm545_vm1, %v453_v19, -inf }
 0x1ad   :  { %577 = vmax.xlane.f32.xlu1 %v1481_v20 }
 0x1af   :  { %v366_v21 = vpop.f32.mrf.mxu3 }
 0x1b0   :  { %v367_v22 = vadd.f32 %v1421_v45, %v366_v21 }
 0x1b1   :  { %v455_v23 = vpop.f32.mrf.mxu2 }
 0x1b2   :  { %v401_v24 = vmax.f32 %v367_v22, 0.0  ;;  %v456_v25 = vadd.f32 %v1454_v63, %v455_v23 }
 0x1b4   :  { %522 = vst [vmem:[#allocation5 + $0x20] sm:$0xff] %v456_v25  ;;  %502 = vmatmul.f32.gmra.mxu3 %v401_v24  ;;  %v1488_v26 = vsel %vm545_vm1, %v456_v25, -inf }
 0x1b5   :  { %579 = vmax.xlane.f32.xlu2 %v1488_v26 }
 0x1b7   :  { %v369_v27 = vpop.f32.mrf.mxu3 }
 0x1b8   :  { %v370_v28 = vadd.f32 %v1421_v45, %v369_v27 }
 0x1b9   :  { %v458_v29 = vpop.f32.mrf.mxu2 }
 0x1ba   :  { %v402_v30 = vmax.f32 %v370_v28, 0.0  ;;  %v459_v31 = vadd.f32 %v1454_v63, %v458_v29 }
 0x1bc   :  { %523 = vst [vmem:[#allocation5 + $0x28] sm:$0xff] %v459_v31  ;;  %505 = vmatmul.f32.gmra.mxu3 %v402_v30  ;;  %v1495_v32 = vsel %vm545_vm1, %v459_v31, -inf }
 0x1bd   :  { %581 = vmax.xlane.f32.xlu2 %v1495_v32 }
 0x1bf   :  { %v372_v33 = vpop.f32.mrf.mxu3 }
 0x1c0   :  { %v373_v35 = vadd.f32 %v1421_v45, %v372_v33 }
 0x1c1   :  { %v461_v36 = vpop.f32.mrf.mxu2 }
 0x1c2   :  { %v403_v37 = vmax.f32 %v373_v35, 0.0  ;;  %v462_v38 = vadd.f32 %v1454_v63, %v461_v36 }
 0x1c4   :  { %524 = vst [vmem:[#allocation5 + $0x30] sm:$0xff] %v462_v38  ;;  %508 = vmatmul.f32.gmra.mxu3 %v403_v37  ;;  %v1502_v39 = vsel %vm545_vm1, %v462_v38, -inf }
 0x1c5   :  { %583 = vmax.xlane.f32.xlu0 %v1502_v39 }
 0x1c7   :  { %v375_v40 = vpop.f32.mrf.mxu3 }
 0x1c8   :  { %v376_v41 = vadd.f32 %v1421_v45, %v375_v40 }
 0x1c9   :  { %v464_v42 = vpop.f32.mrf.mxu2 }
 0x1ca   :  { %v404_v43 = vmax.f32 %v376_v41, 0.0  ;;  %v465_v34 = vadd.f32 %v1454_v63, %v464_v42 }
 0x1cc   :  { %525 = vst [vmem:[#allocation5 + $0x38] sm:$0xff] %v465_v34  ;;  %511 = vmatmul.f32.gmra.mxu3 %v404_v43  ;;  %v1509_v44 = vsel %vm545_vm1, %v465_v34, -inf }
 0x1cd   :  { %585 = vmax.xlane.f32.xlu1 %v1509_v44 }
 0x1cf   :  { %v378_v46 = vpop.f32.mrf.mxu3 }
 0x1d0   :  { %v379_v47 = vadd.f32 %v1421_v45, %v378_v46 }
 0x1d1   :  { %v467_v48 = vpop.f32.mrf.mxu2 }
 0x1d2   :  { %v405_v49 = vmax.f32 %v379_v47, 0.0  ;;  %v468_v50 = vadd.f32 %v1454_v63, %v467_v48 }
 0x1d4   :  { %526 = vst [vmem:[#allocation5 + $0x40] sm:$0xff] %v468_v50  ;;  %514 = vmatmul.f32.gmra.mxu3 %v405_v49  ;;  %v1516_v51 = vsel %vm545_vm1, %v468_v50, -inf }
 0x1d5   :  { %587 = vmax.xlane.f32.xlu2 %v1516_v51 }
 0x1d9   :  { %v470_v52 = vpop.f32.mrf.mxu2 }
 0x1da   :  { %v471_v53 = vadd.f32 %v1454_v63, %v470_v52 }
 0x1dc   :  { %527 = vst [vmem:[#allocation5 + $0x48] sm:$0xff] %v471_v53  ;;  %v1522_v54 = vsel %vm545_vm1, %v471_v53, -inf }
 0x1dd   :  { %589 = vmax.xlane.f32.xlu0 %v1522_v54 }
 0x1e1   :  { %v473_v45 = vpop.f32.mrf.mxu2 }
 0x1e2   :  { %v474_v55 = vadd.f32 %v1454_v63, %v473_v45 }
 0x1e4   :  { %528 = vst [vmem:[#allocation5 + $0x50] sm:$0xff] %v474_v55  ;;  %v1528_v56 = vsel %vm545_vm1, %v474_v55, -inf }
 0x1e5   :  { %591 = vmax.xlane.f32.xlu1 %v1528_v56 }
 0x1e9   :  { %v476_v57 = vpop.f32.mrf.mxu2 }
 0x1ea   :  { %v477_v58 = vadd.f32 %v1454_v63, %v476_v57 }
 0x1ec   :  { %529 = vst [vmem:[#allocation5 + $0x58] sm:$0xff] %v477_v58  ;;  %v1534_v59 = vsel %vm545_vm1, %v477_v58, -inf }
 0x1ed   :  { %593 = vmax.xlane.f32.xlu2 %v1534_v59 }
 0x1f1   :  { %v479_v60 = vpop.f32.mrf.mxu2 }
 0x1f2   :  { %v480_v61 = vadd.f32 %v1454_v63, %v479_v60 }
 0x1f4   :  { %530 = vst [vmem:[#allocation5 + $0x60] sm:$0xff] %v480_v61  ;;  %v1540_v0 = vsel %vm545_vm1, %v480_v61, -inf }
 0x1f5   :  { %595 = vmax.xlane.f32.xlu0 %v1540_v0 }
 0x1f9   :  { %v482_v1 = vpop.f32.mrf.mxu2 }
 0x1fa   :  { %v483_v2 = vadd.f32 %v1454_v63, %v482_v1 }
 0x1fc   :  { %531 = vst [vmem:[#allocation5 + $0x68] sm:$0xff] %v483_v2  ;;  %v1546_v3 = vsel %vm545_vm1, %v483_v2, -inf }
 0x1fd   :  { %597 = vmax.xlane.f32.xlu1 %v1546_v3 }
 0x201   :  { %v485_v4 = vpop.f32.mrf.mxu2 }
 0x202   :  { %v486_v6 = vadd.f32 %v1454_v63, %v485_v4 }
 0x204   :  { %532 = vst [vmem:[#allocation5 + $0x70] sm:$0xff] %v486_v6  ;;  %v1552_v7 = vsel %vm545_vm1, %v486_v6, -inf }
 0x205   :  { %599 = vmax.xlane.f32.xlu2 %v1552_v7 }
 0x208   :  { %v572_v9 = vpop.xlane.xlu0 %571 }
 0x209   :  { %vm621_vm2 = vcmp.eq.f32.partialorder %v1461_v5, %v572_v9  ;;  %v488_v10 = vpop.f32.mrf.mxu2 }
 0x20a   :  { %v1557_v11 = vsel %vm621_vm2, %v1449_v62, 128  ;;  %v489_v12 = vadd.f32 %v1454_v63, %v488_v10 }
 0x20b   :  { %v672_v13 = vshra.s32 %v1557_v11, 16 }
 0x20c   :  { %533 = vst [vmem:[#allocation5 + $0x78] sm:$0xff] %v489_v12  ;;  %v1563_v15 = vsel %vm545_vm1, %v489_v12, -inf }
 0x20d   :  { %601 = vmax.xlane.f32.xlu0 %v1563_v15  ;;  %v1566_v16 = vcvt.s32.f32 %v672_v13 }
 0x20f   :  { %675 = vmin.xlane.f32.xlu1 %v1566_v16 }
 0x210   :  { %v574_v5 = vpop.xlane.xlu0 %573 }
 0x211   :  { %vm622_vm3 = vcmp.eq.f32.partialorder %v1467_v8, %v574_v5  ;;  %v491_v17 = vpop.f32.mrf.mxu2 }
 0x212   :  { %v1571_v18 = vsel %vm622_vm3, %v1449_v62, 128  ;;  %v492_v19 = vadd.f32 %v1454_v63, %v491_v17 }
 0x213   :  { %v686_v21 = vshra.s32 %v1571_v18, 16 }
 0x214   :  { %534 = vst [vmem:[#allocation5 + $0x80] sm:$0xff] %v492_v19  ;;  %v1579_v23 = vsel %vm545_vm1, %v492_v19, -inf }
 0x215   :  { %v1575_v22 = vcvt.s32.f32 %v686_v21 }
 0x217   :  { %603 = vmax.xlane.f32.xlu1 %v1579_v23  ;;  %689 = vmin.xlane.f32.xlu0 %v1575_v22 }
 0x218   :  { %v576_v8 = vpop.xlane.xlu1 %575 }
 0x219   :  { %vm623_vm4 = vcmp.eq.f32.partialorder %v1474_v14, %v576_v8  ;;  %v494_v24 = vpop.f32.mrf.mxu2 }
 0x21a   :  { %v495_v25 = vadd.f32 %v1454_v63, %v494_v24  ;;  %v1586_v27 = vsel %vm623_vm4, %v1449_v62, 128 }
 0x21b   :  { %v700_v29 = vshra.s32 %v1586_v27, 16 }
 0x21c   :  { %535 = vst [vmem:[#allocation5 + $0x88] sm:$0xff] %v495_v25  ;;  %v1590_v28 = vsel %vm545_vm1, %v495_v25, -inf }
 0x21d   :  { %605 = vmax.xlane.f32.xlu2 %v1590_v28  ;;  %v1598_v31 = vcvt.s32.f32 %v700_v29 }
 0x220   :  { %v578_v30 = vpop.xlane.xlu1 %577 }
 0x221   :  { %vm624_vm5 = vcmp.eq.f32.partialorder %v1481_v20, %v578_v30 }
 0x222   :  { %v1596_v14 = vsel %vm624_vm5, %v1449_v62, 128 }
 0x223   :  { %v714_v33 = vshra.s32 %v1596_v14, 16 }
 0x225   :  { %703 = vmin.xlane.f32.xlu2 %v1598_v31  ;;  %v1602_v35 = vcvt.s32.f32 %v714_v33 }
 0x227   :  { %v497_v36 = vpop.f32.mrf.mxu3  ;;  %717 = vmin.xlane.f32.xlu1 %v1602_v35 }
 0x228   :  { %v498_v37 = vadd.f32 %v1454_v63, %v497_v36  ;;  %v580_v38 = vpop.xlane.xlu2 %579 }
 0x229   :  { %vm625_vm6 = vcmp.eq.f32.partialorder %v1488_v26, %v580_v38 }
 0x22a   :  { %536 = vst [vmem:[#allocation5 + $0x90] sm:$0xff] %v498_v37  ;;  %v1608_v20 = vsel %vm625_vm6, %v1449_v62, 128  ;;  %v1612_v40 = vsel %vm545_vm1, %v498_v37, -inf }
 0x22b   :  { %607 = vmax.xlane.f32.xlu0 %v1612_v40  ;;  %v728_v41 = vshra.s32 %v1608_v20, 16 }
 0x22d   :  { %v1618_v46 = vcvt.s32.f32 %v728_v41 }
 0x22f   :  { %v500_v42 = vpop.f32.mrf.mxu3 }
 0x230   :  { %v501_v43 = vadd.f32 %v1454_v63, %v500_v42  ;;  %v582_v34 = vpop.xlane.xlu2 %581 }
 0x231   :  { %vm626_vm7 = vcmp.eq.f32.partialorder %v1495_v32, %v582_v34 }
 0x232   :  { %537 = vst [vmem:[#allocation5 + $0x98] sm:$0xff] %v501_v43  ;;  %v1621_v26 = vsel %vm626_vm7, %v1449_v62, 128  ;;  %v1625_v47 = vsel %vm545_vm1, %v501_v43, -inf }
 0x233   :  { %609 = vmax.xlane.f32.xlu1 %v1625_v47  ;;  %731 = vmin.xlane.f32.xlu0 %v1618_v46  ;;  %v742_v48 = vshra.s32 %v1621_v26, 16 }
 0x235   :  { %v1630_v49 = vcvt.s32.f32 %v742_v48 }
 0x237   :  { %v503_v50 = vpop.f32.mrf.mxu3  ;;  %745 = vmin.xlane.f32.xlu2 %v1630_v49 }
 0x238   :  { %v504_v32 = vadd.f32 %v1454_v63, %v503_v50  ;;  %v584_v52 = vpop.xlane.xlu0 %583 }
 0x239   :  { %vm627_vm8 = vcmp.eq.f32.partialorder %v1502_v39, %v584_v52 }
 0x23a   :  { %538 = vst [vmem:[#allocation5 + $0xa0] sm:$0xff] %v504_v32  ;;  %v1636_v53 = vsel %vm627_vm8, %v1449_v62, 128  ;;  %v1643_v57 = vsel %vm545_vm1, %v504_v32, -inf }
 0x23b   :  { %v756_v45 = vshra.s32 %v1636_v53, 16 }
 0x23d   :  { %v1639_v55 = vcvt.s32.f32 %v756_v45 }
 0x23f   :  { %v506_v58 = vpop.f32.mrf.mxu3  ;;  %611 = vmax.xlane.f32.xlu2 %v1643_v57  ;;  %759 = vmin.xlane.f32.xlu1 %v1639_v55 }
 0x240   :  { %v507_v60 = vadd.f32 %v1454_v63, %v506_v58  ;;  %v586_v39 = vpop.xlane.xlu1 %585 }
 0x241   :  { %vm628_vm9 = vcmp.eq.f32.partialorder %v1509_v44, %v586_v39 }
 0x242   :  { %539 = vst [vmem:[#allocation5 + $0xa8] sm:$0xff] %v507_v60  ;;  %v1650_v61 = vsel %vm628_vm9, %v1449_v62, 128  ;;  %v1654_v1 = vsel %vm545_vm1, %v507_v60, -inf }
 0x243   :  { %613 = vmax.xlane.f32.xlu0 %v1654_v1  ;;  %v770_v2 = vshra.s32 %v1650_v61, 16 }
 0x245   :  { %v1660_v10 = vcvt.s32.f32 %v770_v2 }
 0x247   :  { %v509_v4 = vpop.f32.mrf.mxu3 }
 0x248   :  { %v510_v6 = vadd.f32 %v1454_v63, %v509_v4  ;;  %v588_v9 = vpop.xlane.xlu2 %587 }
 0x249   :  { %vm629_vm10 = vcmp.eq.f32.partialorder %v1516_v51, %v588_v9 }
 0x24a   :  { %540 = vst [vmem:[#allocation5 + $0xb0] sm:$0xff] %v510_v6  ;;  %v1663_v44 = vsel %vm629_vm10, %v1449_v62, 128  ;;  %v1667_v12 = vsel %vm545_vm1, %v510_v6, -inf }
 0x24b   :  { %773 = vmin.xlane.f32.xlu0 %v1660_v10  ;;  %615 = vmax.xlane.f32.xlu1 %v1667_v12  ;;  %v784_v13 = vshra.s32 %v1663_v44, 16 }
 0x24d   :  { %v1672_v5 = vcvt.s32.f32 %v784_v13 }
 0x24f   :  { %v512_v17 = vpop.f32.mrf.mxu3  ;;  %787 = vmin.xlane.f32.xlu2 %v1672_v5 }
 0x250   :  { %v513_v51 = vadd.f32 %v1454_v63, %v512_v17  ;;  %v590_v19 = vpop.xlane.xlu0 %589  ;;  %v685_v17 = vand.u32 65535, %v1571_v18 }
 0x251   :  { %vm630_vm11 = vcmp.eq.f32.partialorder %v1522_v54, %v590_v19 }
 0x252   :  { %541 = vst [vmem:[#allocation5 + $0xb8] sm:$0xff] %v513_v51  ;;  %v1678_v21 = vsel %vm630_vm11, %v1449_v62, 128  ;;  %v1685_v25 = vsel %vm545_vm1, %v513_v51, -inf  ;;  %v687_v19 = vcvt.s32.f32 %v685_v17 }
 0x253   :  { %v798_v8 = vshra.s32 %v1678_v21, 16 }
 0x255   :  { %v1681_v24 = vcvt.s32.f32 %v798_v8 }
 0x257   :  { %v515_v29 = vpop.f32.mrf.mxu3  ;;  %617 = vmax.xlane.f32.xlu2 %v1685_v25  ;;  %801 = vmin.xlane.f32.xlu1 %v1681_v24 }
 0x258   :  { %v516_v30 = vadd.f32 %v1454_v63, %v515_v29  ;;  %v592_v54 = vpop.xlane.xlu1 %591 }
 0x259   :  { %vm631_vm12 = vcmp.eq.f32.partialorder %v1528_v56, %v592_v54 }
 0x25a   :  { %542 = vst [vmem:[#allocation5 + $0xc0] sm:$0xff] %v516_v30  ;;  %v1692_v33 = vsel %vm631_vm12, %v1449_v62, 128  ;;  %v1696_v36 = vsel %vm545_vm1, %v516_v30, -inf }
 0x25b   :  { %619 = vmax.xlane.f32.xlu0 %v1696_v36  ;;  %v812_v37 = vshra.s32 %v1692_v33, 16  ;;  %1059 = dma.vmem_to_hbm [thread:$0]  %s1052_s26, 3200, %s1054_s29, [#allocation4], %s1189_s10, %s1189_s10, %s1190_s11  }
 0x25d   :  { %v1701_v41 = vcvt.s32.f32 %v812_v37  ;;  %v699_v37 = vand.u32 65535, %v1586_v27 }
 0x260   :  { %v594_v38 = vpop.xlane.xlu2 %593 }
 0x261   :  { %vm632_vm13 = vcmp.eq.f32.partialorder %v1534_v59, %v594_v38  ;;  %v713_v38 = vand.u32 65535, %v1596_v14 }
 0x262   :  { %v1704_v63 = vsel %vm632_vm13, %v1449_v62, 128 }
 0x263   :  { %815 = vmin.xlane.f32.xlu0 %v1701_v41  ;;  %v826_v56 = vshra.s32 %v1704_v63, 16  ;;  %v715_v27 = vcvt.s32.f32 %v713_v38 }
 0x265   :  { %v1708_v42 = vcvt.s32.f32 %v826_v56 }
 0x267   :  { %829 = vmin.xlane.f32.xlu2 %v1708_v42 }
 0x268   :  { %v596_v43 = vpop.xlane.xlu0 %595 }
 0x269   :  { %vm633_vm14 = vcmp.eq.f32.partialorder %v1540_v0, %v596_v43 }
 0x26a   :  { %v1713_v34 = vsel %vm633_vm14, %v1449_v62, 128 }
 0x26b   :  { %v840_v59 = vshra.s32 %v1713_v34, 16 }
 0x26d   :  { %v1716_v48 = vcvt.s32.f32 %v840_v59 }
 0x26f   :  { %843 = vmin.xlane.f32.xlu0 %v1716_v48 }
 0x270   :  { %v598_v50 = vpop.xlane.xlu1 %597 }
 0x271   :  { %vm634_vm15 = vcmp.eq.f32.partialorder %v1546_v3, %v598_v50  ;;  %v671_v3 = vand.u32 65535, %v1557_v11 }
 0x272   :  { %v1721_v32 = vsel %vm634_vm15, %v1449_v62, 128 }
 0x273   :  { %v854_v52 = vshra.s32 %v1721_v32, 16  ;;  %v673_v9 = vcvt.s32.f32 %v671_v3  ;;  %v741_v3 = vand.u32 65535, %v1621_v26 }
 0x275   :  { %v1724_v45 = vcvt.s32.f32 %v854_v52  ;;  %v743_v17 = vcvt.s32.f32 %v741_v3 }
 0x277   :  { %857 = vmin.xlane.f32.xlu1 %v1724_v45 }
 0x278   :  { %v600_v0 = vpop.xlane.xlu2 %599 }
 0x279   :  { %vm635_vm0 = vcmp.eq.f32.partialorder %v1552_v7, %v600_v0 }
 0x27a   :  { %v1729_v58 = vsel %vm635_vm0, %v1449_v62, 128 }
 0x27b   :  { %v868_v60 = vshra.s32 %v1729_v58, 16 }
 0x27d   :  { %v1732_v39 = vcvt.s32.f32 %v868_v60 }
 0x27f   :  { %871 = vmin.xlane.f32.xlu2 %v1732_v39 }
 0x280   :  { %v602_v2 = vpop.xlane.xlu0 %601 }
 0x281   :  { %vm636_vm1 = vcmp.eq.f32.partialorder %v1563_v15, %v602_v2 }
 0x282   :  { %v1738_v4 = vsel %vm636_vm1, %v1449_v62, 128  ;;  %v1740_v6 = vpop.xlane.xlu1 %675 }
 0x283   :  { %vm677_vm2 = vcmp.eq.f32.partialorder %v1566_v16, %v1740_v6  ;;  %v882_v7 = vshra.s32 %v1738_v4, 16 }
 0x284   :  { %v678_v51 = vsel %vm677_vm2, %v673_v9, inf }
 0x285   :  { %v1745_v13 = vcvt.s32.f32 %v882_v7 }
 0x287   :  { %679 = vmin.xlane.f32.xlu2 %v678_v51  ;;  %885 = vmin.xlane.f32.xlu0 %v1745_v13 }
 0x28a   :  { %v604_v11 = vpop.xlane.xlu1 %603  ;;  %v1749_v15 = vpop.xlane.xlu0 %689 }
 0x28b   :  { %vm637_vm3 = vcmp.eq.f32.partialorder %v1579_v23, %v604_v11  ;;  %vm691_vm4 = vcmp.eq.f32.partialorder %v1575_v22, %v1749_v15 }
 0x28c   :  { %v1755_v16 = vsel %vm637_vm3, %v1449_v62, 128  ;;  %v692_v8 = vsel %vm691_vm4, %v687_v19, inf }
 0x28d   :  { %693 = vmin.xlane.f32.xlu1 %v692_v8  ;;  %v896_v18 = vshra.s32 %v1755_v16, 16 }
 0x28f   :  { %v1762_v54 = vcvt.s32.f32 %v896_v18 }
 0x290   :  { %v606_v29 = vpop.xlane.xlu2 %605 }
 0x291   :  { %vm638_vm5 = vcmp.eq.f32.partialorder %v1590_v28, %v606_v29  ;;  %v701_v28 = vcvt.s32.f32 %v699_v37 }
 0x292   :  { %v1760_v30 = vsel %vm638_vm5, %v1449_v62, 128 }
 0x293   :  { %v910_v23 = vshra.s32 %v1760_v30, 16 }
 0x295   :  { %899 = vmin.xlane.f32.xlu1 %v1762_v54  ;;  %v1767_v22 = vcvt.s32.f32 %v910_v23 }
 0x297   :  { %913 = vmin.xlane.f32.xlu2 %v1767_v22 }
 0x298   :  { %v1771_v56 = vpop.xlane.xlu2 %703 }
 0x299   :  { %vm705_vm6 = vcmp.eq.f32.partialorder %v1598_v31, %v1771_v56  ;;  %v727_v31 = vand.u32 65535, %v1608_v20 }
 0x29a   :  { %v1775_v43 = vpop.xlane.xlu1 %717  ;;  %v706_v59 = vsel %vm705_vm6, %v701_v28, inf  ;;  %v783_v28 = vand.u32 65535, %v1663_v44 }
 0x29b   :  { %707 = vmin.xlane.f32.xlu0 %v706_v59  ;;  %vm719_vm7 = vcmp.eq.f32.partialorder %v1602_v35, %v1775_v43  ;;  %v729_v7 = vcvt.s32.f32 %v727_v31 }
 0x29c   :  { %v720_v52 = vsel %vm719_vm7, %v715_v27, inf }
 0x29e   :  { %v608_v50 = vpop.xlane.xlu0 %607 }
 0x29f   :  { %vm639_vm8 = vcmp.eq.f32.partialorder %v1612_v40, %v608_v50  ;;  %721 = vmin.xlane.f32.xlu2 %v720_v52 }
 0x2a0   :  { %v1781_v14 = vsel %vm639_vm8, %v1449_v62, 128 }
 0x2a1   :  { %v924_v0 = vshra.s32 %v1781_v14, 16 }
 0x2a3   :  { %v1785_v60 = vcvt.s32.f32 %v924_v0  ;;  %v785_v0 = vcvt.s32.f32 %v783_v28 }
 0x2a5   :  { %927 = vmin.xlane.f32.xlu0 %v1785_v60 }
 0x2a6   :  { %v610_v35 = vpop.xlane.xlu1 %609  ;;  %v1789_v2 = vpop.xlane.xlu0 %731 }
 0x2a7   :  { %vm640_vm9 = vcmp.eq.f32.partialorder %v1625_v47, %v610_v35  ;;  %vm733_vm10 = vcmp.eq.f32.partialorder %v1618_v46, %v1789_v2  ;;  %v755_v47 = vand.u32 65535, %v1636_v53 }
 0x2a8   :  { %v1795_v40 = vsel %vm640_vm9, %v1449_v62, 128  ;;  %v734_v9 = vsel %vm733_vm10, %v729_v7, inf }
 0x2a9   :  { %735 = vmin.xlane.f32.xlu1 %v734_v9  ;;  %v938_v26 = vshra.s32 %v1795_v40, 16  ;;  %v757_v8 = vcvt.s32.f32 %v755_v47 }
 0x2aa   :  { %v1797_v20 = vpop.xlane.xlu2 %745 }
 0x2ab   :  { %vm747_vm11 = vcmp.eq.f32.partialorder %v1630_v49, %v1797_v20  ;;  %v1803_v11 = vcvt.s32.f32 %v938_v26 }
 0x2ac   :  { %v748_v51 = vsel %vm747_vm11, %v743_v17, inf  ;;  %vm1021_vm11 = vcmask 7168  }
 0x2ad   :  { %749 = vmin.xlane.f32.xlu0 %v748_v51 }
 0x2b1   :  { %941 = vmin.xlane.f32.xlu1 %v1803_v11 }
 0x2b2   :  { %v612_v46 = vpop.xlane.xlu2 %611  ;;  %v1806_v19 = vpop.xlane.xlu1 %759 }
 0x2b3   :  { %vm641_vm12 = vcmp.eq.f32.partialorder %v1643_v57, %v612_v46  ;;  %vm761_vm13 = vcmp.eq.f32.partialorder %v1639_v55, %v1806_v19  ;;  %v769_v57 = vand.u32 65535, %v1650_v61 }
 0x2b4   :  { %v1812_v49 = vsel %vm641_vm12, %v1449_v62, 128  ;;  %v762_v18 = vsel %vm761_vm13, %v757_v8, inf  ;;  %v825_v8 = vand.u32 65535, %v1704_v63  ;;  %v853_v63 = vand.u32 65535, %v1721_v32 }
 0x2b5   :  { %763 = vmin.xlane.f32.xlu2 %v762_v18  ;;  %v952_v53 = vshra.s32 %v1812_v49, 16  ;;  %v771_v27 = vcvt.s32.f32 %v769_v57  ;;  %v881_v32 = vand.u32 65535, %v1738_v4 }
 0x2b6   :  { %v614_v29 = vpop.xlane.xlu0 %613 }
 0x2b7   :  { %vm642_vm14 = vcmp.eq.f32.partialorder %v1654_v1, %v614_v29  ;;  %v1821_v38 = vcvt.s32.f32 %v952_v53  ;;  %v827_v29 = vcvt.s32.f32 %v825_v8  ;;  %v710_v8 = vcvt.f32.s32 %v1771_v56 }
 0x2b8   :  { %v1817_v23 = vsel %vm642_vm14, %v1449_v62, 128 }
 0x2b9   :  { %v966_v37 = vshra.s32 %v1817_v23, 16 }
 0x2bb   :  { %v1823_v55 = vcvt.s32.f32 %v966_v37 }
 0x2bd   :  { %955 = vmin.xlane.f32.xlu2 %v1821_v38  ;;  %969 = vmin.xlane.f32.xlu0 %v1823_v55 }
 0x2be   :  { %v616_v1 = vpop.xlane.xlu1 %615  ;;  %v1828_v59 = vpop.xlane.xlu0 %773 }
 0x2bf   :  { %vm643_vm15 = vcmp.eq.f32.partialorder %v1667_v12, %v616_v1  ;;  %vm775_vm0 = vcmp.eq.f32.partialorder %v1660_v10, %v1828_v59  ;;  %v797_v12 = vand.u32 65535, %v1678_v21  ;;  %v855_v1 = vcvt.s32.f32 %v853_v63 }
 0x2c0   :  { %v1834_v61 = vsel %vm643_vm15, %v1449_v62, 128  ;;  %v776_v50 = vsel %vm775_vm0, %v771_v27, inf  ;;  %v923_v63 = vand.u32 65535, %v1781_v14  ;;  %v752_v14 = vcvt.f32.s32 %v1797_v20 }
 0x2c1   :  { %777 = vmin.xlane.f32.xlu1 %v776_v50  ;;  %v980_v44 = vshra.s32 %v1834_v61, 16  ;;  %v799_v7 = vcvt.s32.f32 %v797_v12 }
 0x2c2   :  { %v1836_v52 = vpop.xlane.xlu2 %787 }
 0x2c3   :  { %vm789_vm1 = vcmp.eq.f32.partialorder %v1672_v5, %v1836_v52  ;;  %v1842_v3 = vcvt.s32.f32 %v980_v44 }
 0x2c4   :  { %v790_v31 = vsel %vm789_vm1, %v785_v0, inf  ;;  %v682_v0 = vcvt.f32.s32 %v1740_v6 }
 0x2c5   :  { %791 = vmin.xlane.f32.xlu0 %v790_v31 }
 0x2c6   :  { %v683_v12 = vshll.u32 %v682_v0, 16 }
 0x2c9   :  { %983 = vmin.xlane.f32.xlu1 %v1842_v3 }
 0x2ca   :  { %v618_v10 = vpop.xlane.xlu2 %617  ;;  %v1845_v35 = vpop.xlane.xlu1 %801 }
 0x2cb   :  { %vm644_vm2 = vcmp.eq.f32.partialorder %v1685_v25, %v618_v10  ;;  %vm803_vm3 = vcmp.eq.f32.partialorder %v1681_v24, %v1845_v35  ;;  %v811_v25 = vand.u32 65535, %v1692_v33  ;;  %v839_v33 = vand.u32 65535, %v1713_v34 }
 0x2cc   :  { %v1851_v5 = vsel %vm644_vm2, %v1449_v62, 128  ;;  %v804_v9 = vsel %vm803_vm3, %v799_v7, inf  ;;  %v867_v34 = vand.u32 65535, %v1729_v58  ;;  %v696_v7 = vcvt.f32.s32 %v1749_v15 }
 0x2cd   :  { %805 = vmin.xlane.f32.xlu2 %v804_v9  ;;  %v994_v21 = vshra.s32 %v1851_v5, 16  ;;  %v841_v57 = vcvt.s32.f32 %v839_v33 }
 0x2ce   :  { %v620_v17 = vpop.xlane.xlu0 %619  ;;  %v869_v50 = vcvt.s32.f32 %v867_v34  ;;  %v697_v6 = vshll.u32 %v696_v7, 16  ;;  %v766_v7 = vcvt.f32.s32 %v1806_v19 }
 0x2cf   :  { %vm645_vm4 = vcmp.eq.f32.partialorder %v1696_v36, %v620_v17  ;;  %v1860_v47 = vcvt.s32.f32 %v994_v21  ;;  %v813_v36 = vcvt.s32.f32 %v811_v25  ;;  %v895_v21 = vand.u32 65535, %v1755_v16 }
 0x2d0   :  { %v1856_v26 = vsel %vm645_vm4, %v1449_v62, 128 }
 0x2d1   :  { %v1008_v51 = vshra.s32 %v1856_v26, 16 }
 0x2d3   :  { %v1862_v24 = vcvt.s32.f32 %v1008_v51  ;;  %v897_v51 = vcvt.s32.f32 %v895_v21 }
 0x2d5   :  { %997 = vmin.xlane.f32.xlu2 %v1860_v47  ;;  %1011 = vmin.xlane.f32.xlu0 %v1862_v24 }
 0x2d6   :  { %v1866_v46 = vpop.xlane.xlu0 %815 }
 0x2d7   :  { %vm817_vm5 = vcmp.eq.f32.partialorder %v1701_v41, %v1866_v46 }
 0x2d8   :  { %v818_v62 = vsel %vm817_vm5, %v813_v36, inf }
 0x2d9   :  { %819 = vmin.xlane.f32.xlu1 %v818_v62 }
 0x2da   :  { %v1871_v18 = vpop.xlane.xlu2 %829 }
 0x2db   :  { %vm831_vm6 = vcmp.eq.f32.partialorder %v1708_v42, %v1871_v18 }
 0x2dc   :  { %v832_v53 = vsel %vm831_vm6, %v827_v29, inf  ;;  %v724_v29 = vcvt.f32.s32 %v1775_v43  ;;  %v925_v43 = vcvt.s32.f32 %v923_v63  ;;  %v993_v63 = vand.u32 65535, %v1851_v5 }
 0x2e1   :  { %833 = vmin.xlane.f32.xlu1 %v832_v53 }
 0x2e2   :  { %v1876_v37 = vpop.xlane.xlu0 %843 }
 0x2e3   :  { %vm845_vm7 = vcmp.eq.f32.partialorder %v1716_v48, %v1876_v37 }
 0x2e4   :  { %v846_v41 = vsel %vm845_vm7, %v841_v57, inf }
 0x2e5   :  { %847 = vmin.xlane.f32.xlu2 %v846_v41 }
 0x2ea   :  { %v1881_v28 = vpop.xlane.xlu1 %857 }
 0x2eb   :  { %vm859_vm8 = vcmp.eq.f32.partialorder %v1724_v45, %v1881_v28  ;;  %v883_v45 = vcvt.s32.f32 %v881_v32 }
 0x2ec   :  { %v860_v42 = vsel %vm859_vm8, %v855_v1, inf }
 0x2ed   :  { %861 = vmin.xlane.f32.xlu0 %v860_v42  ;;  %v738_v42 = vcvt.f32.s32 %v1789_v2 }
 0x2f2   :  { %v1886_v27 = vpop.xlane.xlu2 %871 }
 0x2f3   :  { %vm873_vm9 = vcmp.eq.f32.partialorder %v1732_v39, %v1886_v27 }
 0x2f4   :  { %v874_v48 = vsel %vm873_vm9, %v869_v50, inf }
 0x2f5   :  { %875 = vmin.xlane.f32.xlu1 %v874_v48  ;;  %v739_v48 = vshll.u32 %v738_v42, 16  ;;  %v995_v42 = vcvt.s32.f32 %v993_v63 }
 0x2fa   :  { %v680_v44 = vpop.xlane.xlu2 %679  ;;  %v1892_v31 = vpop.xlane.xlu0 %885 }
 0x2fb   :  { %v681_v10 = vcvt.f32.s32 %v680_v44  ;;  %vm887_vm10 = vcmp.eq.f32.partialorder %v1745_v13, %v1892_v31  ;;  %v909_v13 = vand.u32 65535, %v1760_v30  ;;  %v711_v30 = vshll.u32 %v710_v8, 16 }
 0x2fc   :  { %v888_v58 = vsel %vm887_vm10, %v883_v45, inf  ;;  %v937_v44 = vand.u32 65535, %v1795_v40  ;;  %v794_v8 = vcvt.f32.s32 %v1836_v52 }
 0x2fd   :  { %v684_v39 = vadd.s32 %v683_v12, %v681_v10  ;;  %889 = vmin.xlane.f32.xlu2 %v888_v58  ;;  %v911_v62 = vcvt.s32.f32 %v909_v13  ;;  %v753_v12 = vshll.u32 %v752_v14, 16 }
 0x2fe   :  { %v939_v58 = vcvt.s32.f32 %v937_v44  ;;  %v836_v44 = vcvt.f32.s32 %v1871_v18 }
 0x2ff   :  { %1022 = vst.msk [vmem:[%s2079_s8] sm:$0xff] %vm1021_vm11, %v684_v39  ;;  %v767_v39 = vshll.u32 %v766_v7, 16  ;;  %v864_v7 = vcvt.f32.s32 %v1881_v28 }
 0x300   :  { %v694_v4 = vpop.xlane.xlu1 %693 }
 0x301   :  { %v695_v9 = vcvt.f32.s32 %v694_v4 }
 0x303   :  { %v698_v17 = vadd.s32 %v697_v6, %v695_v9  ;;  %v951_v9 = vand.u32 65535, %v1812_v49 }
 0x305   :  { %1023 = vst.msk [vmem:[%s2079_s8 + $0x8] sm:$0xff] %vm1021_vm11, %v698_v17  ;;  %v965_v17 = vand.u32 65535, %v1817_v23 }
 0x307   :  { %v967_v13 = vcvt.s32.f32 %v965_v17 }
 0x308   :  { %v1907_v15 = vpop.xlane.xlu1 %899 }
 0x309   :  { %vm901_vm12 = vcmp.eq.f32.partialorder %v1762_v54, %v1907_v15  ;;  %v725_v54 = vshll.u32 %v724_v29, 16 }
 0x30a   :  { %v1911_v25 = vpop.xlane.xlu2 %913  ;;  %v902_v36 = vsel %vm901_vm12, %v897_v51, inf  ;;  %v780_v51 = vcvt.f32.s32 %v1828_v59  ;;  %v795_v59 = vshll.u32 %v794_v8, 16 }
 0x30b   :  { %903 = vmin.xlane.f32.xlu0 %v902_v36  ;;  %vm915_vm13 = vcmp.eq.f32.partialorder %v1767_v22, %v1911_v25 }
 0x30c   :  { %v916_v16 = vsel %vm915_vm13, %v911_v62, inf  ;;  %v781_v62 = vshll.u32 %v780_v51, 16 }
 0x30d   :  { %917 = vmin.xlane.f32.xlu1 %v916_v16 }
 0x30e   :  { %v708_v33 = vpop.xlane.xlu0 %707 }
 0x30f   :  { %v709_v53 = vcvt.f32.s32 %v708_v33 }
 0x311   :  { %v712_v57 = vadd.s32 %v711_v30, %v709_v53  ;;  %v979_v30 = vand.u32 65535, %v1834_v61 }
 0x312   :  { %v722_v41 = vpop.xlane.xlu2 %721 }
 0x313   :  { %1024 = vst.msk [vmem:[%s2079_s8 + $0x10] sm:$0xff] %vm1021_vm11, %v712_v57  ;;  %v723_v56 = vcvt.f32.s32 %v722_v41  ;;  %v981_v57 = vcvt.s32.f32 %v979_v30  ;;  %v808_v41 = vcvt.f32.s32 %v1845_v35 }
 0x315   :  { %v726_v1 = vadd.s32 %v725_v54, %v723_v56  ;;  %v809_v54 = vshll.u32 %v808_v41, 16 }
 0x317   :  { %1025 = vst.msk [vmem:[%s2079_s8 + $0x18] sm:$0xff] %vm1021_vm11, %v726_v1  ;;  %v1007_v1 = vand.u32 65535, %v1856_v26 }
 0x318   :  { %v1926_v22 = vpop.xlane.xlu0 %927 }
 0x319   :  { %vm929_vm14 = vcmp.eq.f32.partialorder %v1785_v60, %v1926_v22 }
 0x31a   :  { %v930_v34 = vsel %vm929_vm14, %v925_v43, inf }
 0x31b   :  { %931 = vmin.xlane.f32.xlu2 %v930_v34  ;;  %v1009_v34 = vcvt.s32.f32 %v1007_v1 }
 0x31c   :  { %v736_v50 = vpop.xlane.xlu1 %735 }
 0x31d   :  { %v737_v32 = vcvt.f32.s32 %v736_v50  ;;  %v822_v50 = vcvt.f32.s32 %v1866_v46 }
 0x31f   :  { %v740_v0 = vadd.s32 %v739_v48, %v737_v32  ;;  %v823_v14 = vshll.u32 %v822_v50, 16 }
 0x320   :  { %v750_v45 = vpop.xlane.xlu0 %749 }
 0x321   :  { %1026 = vst.msk [vmem:[%s2079_s8 + $0x20] sm:$0xff] %vm1021_vm11, %v740_v0  ;;  %v751_v2 = vcvt.f32.s32 %v750_v45  ;;  %v850_v45 = vcvt.f32.s32 %v1876_v37  ;;  %v865_v37 = vshll.u32 %v864_v7, 16 }
 0x323   :  { %v754_v10 = vadd.s32 %v753_v12, %v751_v2 }
 0x324   :  { %v1937_v60 = vpop.xlane.xlu1 %941 }
 0x325   :  { %1027 = vst.msk [vmem:[%s2079_s8 + $0x28] sm:$0xff] %vm1021_vm11, %v754_v10  ;;  %vm943_vm15 = vcmp.eq.f32.partialorder %v1803_v11, %v1937_v60  ;;  %v953_v11 = vcvt.s32.f32 %v951_v9  ;;  %v851_v10 = vshll.u32 %v850_v45, 16  ;;  %v948_v41 = vcvt.f32.s32 %v1937_v60 }
 0x326   :  { %v944_v40 = vsel %vm943_vm15, %v939_v58, inf }
 0x327   :  { %945 = vmin.xlane.f32.xlu0 %v944_v40 }
 0x328   :  { %v764_v20 = vpop.xlane.xlu2 %763 }
 0x329   :  { %v765_v4 = vcvt.f32.s32 %v764_v20 }
 0x32b   :  { %v768_v6 = vadd.s32 %v767_v39, %v765_v4  ;;  %v878_v4 = vcvt.f32.s32 %v1886_v27 }
 0x32d   :  { %1028 = vst.msk [vmem:[%s2079_s8 + $0x30] sm:$0xff] %vm1021_vm11, %v768_v6  ;;  %v879_v9 = vshll.u32 %v878_v4, 16 }
 0x330   :  { %v1952_v19 = vpop.xlane.xlu2 %955  ;;  %v1954_v21 = vpop.xlane.xlu0 %969 }
 0x331   :  { %vm957_vm0 = vcmp.eq.f32.partialorder %v1821_v38, %v1952_v19  ;;  %vm971_vm1 = vcmp.eq.f32.partialorder %v1823_v55, %v1954_v21 }
 0x332   :  { %v958_v49 = vsel %vm957_vm0, %v953_v11, inf  ;;  %v972_v23 = vsel %vm971_vm1, %v967_v13, inf  ;;  %v892_v11 = vcvt.f32.s32 %v1892_v31 }
 0x333   :  { %959 = vmin.xlane.f32.xlu1 %v958_v49  ;;  %973 = vmin.xlane.f32.xlu2 %v972_v23  ;;  %v906_v23 = vcvt.f32.s32 %v1907_v15  ;;  %v934_v15 = vcvt.f32.s32 %v1926_v22  ;;  %v962_v22 = vcvt.f32.s32 %v1952_v19 }
 0x334   :  { %v778_v36 = vpop.xlane.xlu1 %777  ;;  %v893_v51 = vshll.u32 %v892_v11, 16 }
 0x335   :  { %v779_v16 = vcvt.f32.s32 %v778_v36  ;;  %v920_v36 = vcvt.f32.s32 %v1911_v25  ;;  %v907_v31 = vshll.u32 %v906_v23, 16 }
 0x337   :  { %v782_v33 = vadd.s32 %v781_v62, %v779_v16 }
 0x338   :  { %v792_v29 = vpop.xlane.xlu0 %791 }
 0x339   :  { %1029 = vst.msk [vmem:[%s2079_s8 + $0x38] sm:$0xff] %vm1021_vm11, %v782_v33  ;;  %v793_v38 = vcvt.f32.s32 %v792_v29  ;;  %v921_v33 = vshll.u32 %v920_v36, 16 }
 0x33b   :  { %v796_v55 = vadd.s32 %v795_v59, %v793_v38  ;;  %v935_v38 = vshll.u32 %v934_v15, 16 }
 0x33c   :  { %v1967_v53 = vpop.xlane.xlu1 %983 }
 0x33d   :  { %1030 = vst.msk [vmem:[%s2079_s8 + $0x40] sm:$0xff] %vm1021_vm11, %v796_v55  ;;  %vm985_vm2 = vcmp.eq.f32.partialorder %v1842_v3, %v1967_v53  ;;  %v990_v19 = vcvt.f32.s32 %v1967_v53 }
 0x33e   :  { %v986_v61 = vsel %vm985_vm2, %v981_v57, inf }
 0x33f   :  { %987 = vmin.xlane.f32.xlu0 %v986_v61 }
 0x340   :  { %v806_v52 = vpop.xlane.xlu2 %805 }
 0x341   :  { %v807_v56 = vcvt.f32.s32 %v806_v52  ;;  %v949_v52 = vshll.u32 %v948_v41, 16 }
 0x343   :  { %v810_v35 = vadd.s32 %v809_v54, %v807_v56 }
 0x345   :  { %1031 = vst.msk [vmem:[%s2079_s8 + $0x48] sm:$0xff] %vm1021_vm11, %v810_v35  ;;  %v976_v35 = vcvt.f32.s32 %v1954_v21 }
 0x348   :  { %v1988_v3 = vpop.xlane.xlu2 %997  ;;  %v1990_v43 = vpop.xlane.xlu0 %1011 }
 0x349   :  { %vm999_vm3 = vcmp.eq.f32.partialorder %v1860_v47, %v1988_v3  ;;  %vm1013_vm4 = vcmp.eq.f32.partialorder %v1862_v24, %v1990_v43  ;;  %v837_v47 = vshll.u32 %v836_v44, 16  ;;  %v1018_v44 = vcvt.f32.s32 %v1990_v43 }
 0x34a   :  { %v1000_v5 = vsel %vm999_vm3, %v995_v42, inf  ;;  %v1014_v26 = vsel %vm1013_vm4, %v1009_v34, inf  ;;  %v963_v42 = vshll.u32 %v962_v22, 16  ;;  %v977_v34 = vshll.u32 %v976_v35, 16 }
 0x34b   :  { %1001 = vmin.xlane.f32.xlu1 %v1000_v5  ;;  %1015 = vmin.xlane.f32.xlu2 %v1014_v26 }
 0x34c   :  { %v820_v48 = vpop.xlane.xlu1 %819 }
 0x34d   :  { %v821_v32 = vcvt.f32.s32 %v820_v48  ;;  %v991_v48 = vshll.u32 %v990_v19, 16 }
 0x34f   :  { %v824_v0 = vadd.s32 %v823_v14, %v821_v32 }
 0x351   :  { %1032 = vst.msk [vmem:[%s2079_s8 + $0x50] sm:$0xff] %vm1021_vm11, %v824_v0  ;;  %v1004_v0 = vcvt.f32.s32 %v1988_v3 }
 0x353   :  { %v1005_v45 = vshll.u32 %v1004_v0, 16 }
 0x354   :  { %v834_v46 = vpop.xlane.xlu1 %833 }
 0x355   :  { %v835_v24 = vcvt.f32.s32 %v834_v46 }
 0x357   :  { %v838_v12 = vadd.s32 %v837_v47, %v835_v24  ;;  %v1019_v24 = vshll.u32 %v1018_v44, 16 }
 0x358   :  { %v848_v2 = vpop.xlane.xlu2 %847 }
 0x359   :  { %1033 = vst.msk [vmem:[%s2079_s8 + $0x58] sm:$0xff] %vm1021_vm11, %v838_v12  ;;  %v849_v58 = vcvt.f32.s32 %v848_v2 }
 0x35b   :  { %v852_v18 = vadd.s32 %v851_v10, %v849_v58 }
 0x35d   :  { %1034 = vst.msk [vmem:[%s2079_s8 + $0x60] sm:$0xff] %vm1021_vm11, %v852_v18 }
 0x360   :  { %v862_v40 = vpop.xlane.xlu0 %861 }
 0x361   :  { %v863_v20 = vcvt.f32.s32 %v862_v40 }
 0x363   :  { %v866_v39 = vadd.s32 %v865_v37, %v863_v20 }
 0x365   :  { %1035 = vst.msk [vmem:[%s2079_s8 + $0x68] sm:$0xff] %vm1021_vm11, %v866_v39 }
 0x368   :  { %v876_v6 = vpop.xlane.xlu1 %875 }
 0x369   :  { %v877_v17 = vcvt.f32.s32 %v876_v6 }
 0x36b   :  { %v880_v28 = vadd.s32 %v879_v9, %v877_v17 }
 0x36d   :  { %1036 = vst.msk [vmem:[%s2079_s8 + $0x70] sm:$0xff] %vm1021_vm11, %v880_v28 }
 0x370   :  { %v890_v13 = vpop.xlane.xlu2 %889 }
 0x371   :  { %v891_v49 = vcvt.f32.s32 %v890_v13 }
 0x373   :  { %v894_v27 = vadd.s32 %v893_v51, %v891_v49 }
 0x375   :  { %1037 = vst.msk [vmem:[%s2079_s8 + $0x78] sm:$0xff] %vm1021_vm11, %v894_v27 }
 0x37e   :  { %v904_v62 = vpop.xlane.xlu0 %903 }
 0x37f   :  { %v905_v8 = vcvt.f32.s32 %v904_v62 }
 0x380   :  { %v918_v16 = vpop.xlane.xlu1 %917 }
 0x381   :  { %v908_v30 = vadd.s32 %v907_v31, %v905_v8  ;;  %v919_v29 = vcvt.f32.s32 %v918_v16 }
 0x383   :  { %1038 = vst.msk [vmem:[%s2079_s8 + $0x80] sm:$0xff] %vm1021_vm11, %v908_v30  ;;  %v922_v59 = vadd.s32 %v921_v33, %v919_v29 }
 0x385   :  { %1039 = vst.msk [vmem:[%s2079_s8 + $0x88] sm:$0xff] %vm1021_vm11, %v922_v59 }
 0x38e   :  { %v932_v25 = vpop.xlane.xlu2 %931 }
 0x38f   :  { %v933_v55 = vcvt.f32.s32 %v932_v25 }
 0x391   :  { %v936_v57 = vadd.s32 %v935_v38, %v933_v55 }
 0x393   :  { %1040 = vst.msk [vmem:[%s2079_s8 + $0x90] sm:$0xff] %vm1021_vm11, %v936_v57 }
 0x39a   :  { %v946_v61 = vpop.xlane.xlu0 %945 }
 0x39b   :  { %v947_v54 = vcvt.f32.s32 %v946_v61 }
 0x39d   :  { %v950_v56 = vadd.s32 %v949_v52, %v947_v54 }
 0x39f   :  { %1041 = vst.msk [vmem:[%s2079_s8 + $0x98] sm:$0xff] %vm1021_vm11, %v950_v56 }
 0x3a6   :  { %v960_v63 = vpop.xlane.xlu1 %959  ;;  %v974_v1 = vpop.xlane.xlu2 %973 }
 0x3a7   :  { %v961_v50 = vcvt.f32.s32 %v960_v63  ;;  %v975_v5 = vcvt.f32.s32 %v974_v1 }
 0x3a9   :  { %v964_v60 = vadd.s32 %v963_v42, %v961_v50  ;;  %v978_v26 = vadd.s32 %v977_v34, %v975_v5 }
 0x3ab   :  { %1042 = vst.msk [vmem:[%s2079_s8 + $0xa0] sm:$0xff] %vm1021_vm11, %v964_v60 }
 0x3ac   :  { %1043 = vst.msk [vmem:[%s2079_s8 + $0xa8] sm:$0xff] %vm1021_vm11, %v978_v26 }
 0x3b2   :  { %v988_v21 = vpop.xlane.xlu0 %987 }
 0x3b3   :  { %v989_v14 = vcvt.f32.s32 %v988_v21 }
 0x3b5   :  { %v992_v32 = vadd.s32 %v991_v48, %v989_v14 }
 0x3b7   :  { %1044 = vst.msk [vmem:[%s2079_s8 + $0xb0] sm:$0xff] %vm1021_vm11, %v992_v32 }
 0x3be   :  { %v1002_v46 = vpop.xlane.xlu1 %1001  ;;  %v1016_v47 = vpop.xlane.xlu2 %1015 }
 0x3bf   :  { %v1003_v12 = vcvt.f32.s32 %v1002_v46  ;;  %v1017_v2 = vcvt.f32.s32 %v1016_v47 }
 0x3c1   :  { %v1006_v53 = vadd.s32 %v1005_v45, %v1003_v12  ;;  %v1020_v10 = vadd.s32 %v1019_v24, %v1017_v2 }
 0x3c3   :  { %1045 = vst.msk [vmem:[%s2079_s8 + $0xb8] sm:$0xff] %vm1021_vm11, %v1006_v53 }
 0x3c4   :  { %1046 = vst.msk [vmem:[%s2079_s8 + $0xc0] sm:$0xff] %vm1021_vm11, %v1020_v10 }
 0x3c5   :  { %1186 = dma.done.wait [#allocation4], 3200  }
 0x3c6   :  { %1187 = vsyncadd [#allocation4], 4294964096 }
 0x3c7   :  { %1068 = vsyncpa [#allocation3], 1 }
 0x3c8   :  { %1069 = vsyncpa [#allocation4], 1 }

</bundles_post_ra>
